<compile_context>
chip_gen: v7x
topology: tpu7x:2x2x1
jax: 0.10.0
libtpu: 0.0.40
codegen_flags: <defaults>
</compile_context>

<pallas_src>
import math
import functools

import jax
import jax.numpy as jnp
from jax import lax
from jax.experimental import pallas as pl
from jax.experimental.pallas import tpu as pltpu

LN_EPS = 1e-5          # torch nn.LayerNorm default
NEG_INF = jnp.float32(-1e30)

PARAM_ORDER = ("ln1_g", "ln1_b", "w_in", "b_in", "w_out_h", "b_out",
               "ln2_g", "ln2_b", "w_fc", "b_fc", "w_pj", "b_pj")


def _layer_norm_1pass(x, gamma, beta):
    # single pass: var = E[x^2] - E[x]^2  (one cross-lane reduction less than two-pass)
    m = jnp.mean(x, axis=-1, keepdims=True)
    m2 = jnp.mean(x * x, axis=-1, keepdims=True)
    var = jnp.maximum(m2 - m * m, 0.0)
    return (x - m) * lax.rsqrt(var + LN_EPS) * gamma + beta


def _gelu_exact(x):
    # torch nn.GELU() default (erf-based)
    return 0.5 * x * (1.0 + lax.erf(x * jnp.float32(1.0 / math.sqrt(2.0))))


def _fused_blocks_kernel(x_ref, bias_ref,
                         ln1_g, ln1_b, w_in, b_in, w_out_h, b_out,
                         ln2_g, ln2_b, w_fc, b_fc, w_pj, b_pj,
                         o_ref, x_carry, *, heads):
    l = pl.program_id(1)

    @pl.when(l == 0)
    def _():                              # start of a new batch row: load residual stream
        x_carry[...] = x_ref[0]

    x = x_carry[...]                      # (S, W) f32 residual stream
    S, W = x.shape
    D = W // heads
    scale = jnp.float32(1.0 / math.sqrt(D))
    bias = bias_ref[0]                    # (1, S) additive key-padding bias (f32)

    # ---- attention branch: x = x + out_proj(MHA(ln_1(x))) ----
    h = _layer_norm_1pass(x, ln1_g[0], ln1_b[0])
    qkv = jnp.dot(h.astype(jnp.bfloat16), w_in[0],
                  preferred_element_type=jnp.float32) + b_in[0]      # (S, 3W) f32

    # split heads: (S, 3W) -> (H, S, D) via static lane slices + leading-axis stack
    def head_stack(base):
        return jnp.stack([qkv[:, base + hd * D: base + (hd + 1) * D]
                          for hd in range(heads)], axis=0)
    # fold the 1/sqrt(D) attention scale into q (S*D mults instead of S*S)
    q = (head_stack(0) * scale).astype(jnp.bfloat16)     # (H, S, D) bf16
    k = head_stack(W).astype(jnp.bfloat16)
    v = head_stack(2 * W).astype(jnp.bfloat16)

    s = jnp.einsum("hqd,hkd->hqk", q, k,
                   preferred_element_type=jnp.float32)               # (H, S, S) f32
    s = s + bias[None]                                               # mask keys (additive bias)
    m = jnp.max(s, axis=-1, keepdims=True)
    p = jnp.exp(s - m)
    p = p * pl.reciprocal(jnp.sum(p, axis=-1, keepdims=True), approx=True)
    o = jnp.einsum("hqk,hkd->hqd", p.astype(jnp.bfloat16), v,
                   preferred_element_type=jnp.float32)               # (H, S, D) f32

    # output projection: sum_h o[h] @ W_out[h*D:(h+1)*D, :]  ==  concat(o) @ W_out
    attn = jnp.einsum("hsd,hdw->hsw", o.astype(jnp.bfloat16), w_out_h[0],
                      preferred_element_type=jnp.float32)            # (H, S, W) f32
    attn = jnp.sum(attn, axis=0) + b_out[0]
    x = x + attn

    # ---- MLP branch: x = x + c_proj(gelu(c_fc(ln_2(x)))) ----  (dropout p=0 -> identity)
    h2 = _layer_norm_1pass(x, ln2_g[0], ln2_b[0])
    fc = jnp.dot(h2.astype(jnp.bfloat16), w_fc[0],
                 preferred_element_type=jnp.float32) + b_fc[0]       # (S, 4W) f32
    fc = _gelu_exact(fc)
    mlp = jnp.dot(fc.astype(jnp.bfloat16), w_pj[0],
                  preferred_element_type=jnp.float32) + b_pj[0]
    x = x + mlp

    x_carry[...] = x

    @pl.when(l == pl.num_programs(1) - 1)
    def _():
        o_ref[0] = x.astype(o_ref.dtype)


def self_attention_blocks(x, layer_params, heads, key_padding_mask=None):
    B, S, W = x.shape
    L = len(layer_params)
    assert W % heads == 0
    D = W // heads

    if key_padding_mask is None:
        mask_bias = jnp.zeros((B, 1, S), jnp.float32)
    else:
        mask_bias = jnp.where(key_padding_mask, NEG_INF, 0.0).astype(jnp.float32).reshape(B, 1, S)

    # per-layer kernel params: matmul weights -> bf16, out_proj weight pre-split per head
    def kernel_params(p):
        return dict(
            ln1_g=p["ln1_g"], ln1_b=p["ln1_b"],
            w_in=p["w_in"].astype(jnp.bfloat16), b_in=p["b_in"],
            w_out_h=p["w_out"].reshape(heads, D, W).astype(jnp.bfloat16),
            b_out=p["b_out"],
            ln2_g=p["ln2_g"], ln2_b=p["ln2_b"],
            w_fc=p["w_fc"].astype(jnp.bfloat16), b_fc=p["b_fc"],
            w_pj=p["w_pj"].astype(jnp.bfloat16), b_pj=p["b_pj"],
        )
    per_layer = [kernel_params(p) for p in layer_params]
    stacked = [jnp.stack([lp[name] for lp in per_layer], axis=0) for name in PARAM_ORDER]

    def io_spec():
        return pl.BlockSpec((1, S, W), lambda b, l: (b, 0, 0))

    def param_spec(arr):
        nd = arr.ndim
        return pl.BlockSpec((1,) + arr.shape[1:],
                            lambda b, l, _nd=nd: (l,) + (0,) * (_nd - 1))

    in_specs = [
        io_spec(),                                          # x: one batch row per b
        pl.BlockSpec((1, 1, S), lambda b, l: (b, 0, 0)),    # key-padding bias for that row
    ] + [param_spec(a) for a in stacked]                    # layer-l weights per grid step

    # explicit scoped-VMEM budget: double-buffered blocks + carry + intermediate headroom
    def per_layer_block_bytes(a):
        return (int(a.size) // int(a.shape[0])) * a.dtype.itemsize
    per_step = 2 * 2 * S * W * 4                             # x-in + out blocks, double-buffered
    per_step += 2 * S * 4                                    # mask bias block
    per_step += 2 * sum(per_layer_block_bytes(a) for a in stacked)
    per_step += S * W * 4                                    # VMEM carry scratch
    per_step += 4 * 4 * (heads * S * S + heads * S * W + S * 4 * W)   # in-kernel intermediates
    vmem_limit = int(min(100 * 2**20, max(8 * 2**20, 2 * per_step)))

    kernel = functools.partial(_fused_blocks_kernel, heads=heads)
    return pl.pallas_call(
        kernel,
        out_shape=jax.ShapeDtypeStruct((B, S, W), x.dtype),
        grid=(B, L),
        in_specs=in_specs,
        out_specs=io_spec(),
        scratch_shapes=[pltpu.VMEM((S, W), jnp.float32)],
        input_output_aliases={0: 0},
        compiler_params=pltpu.CompilerParams(
            dimension_semantics=("parallel", "arbitrary"),
            vmem_limit_bytes=vmem_limit),
    )(x, mask_bias, *stacked)


# ---------------- deterministic parameter init (synthetic weights, f32 master copy) ----------------
def init_params(key, width, layers):
    std = 0.02
    out = []
    for layer in range(layers):
        ks = jax.random.split(jax.random.fold_in(key, layer), 8)
        n = lambda k, shape: (std * jax.random.normal(k, shape)).astype(jnp.float32)
        out.append(dict(
            ln1_g=jnp.ones((1, width), jnp.float32),
            ln1_b=jnp.zeros((1, width), jnp.float32),
            w_in=n(ks[0], (width, 3 * width)),     # torch in_proj_weight.T
            b_in=n(ks[1], (1, 3 * width)),
            w_out=n(ks[2], (width, width)),        # torch out_proj.weight.T
            b_out=n(ks[3], (1, width)),
            ln2_g=jnp.ones((1, width), jnp.float32),
            ln2_b=jnp.zeros((1, width), jnp.float32),
            w_fc=n(ks[4], (width, 4 * width)),     # c_fc.weight.T
            b_fc=n(ks[5], (1, 4 * width)),
            w_pj=n(ks[6], (4 * width, width)),     # c_proj.weight.T
            b_pj=n(ks[7], (1, width)),
        ))
    return out


# ---------------- pure-JAX f32 reference (faithful to the torch module) ----------------
def _ref_layer_norm(x, g, b):
    mu = jnp.mean(x, axis=-1, keepdims=True)
    var = jnp.mean(jnp.square(x - mu), axis=-1, keepdims=True)
    return (x - mu) / jnp.sqrt(var + LN_EPS) * g + b


def ref_forward(x, layer_params, heads, key_padding_mask=None):
    B, S, W = x.shape
    D = W // heads
    if key_padding_mask is None:
        bias = jnp.zeros((B, 1, 1, S), jnp.float32)
    else:
        bias = jnp.where(key_padding_mask, NEG_INF, 0.0)[:, None, None, :].astype(jnp.float32)
    for p in layer_params:
        h = _ref_layer_norm(x, p["ln1_g"], p["ln1_b"])
        qkv = h @ p["w_in"] + p["b_in"]
        q, k, v = jnp.split(qkv, 3, axis=-1)
        q = q.reshape(B, S, heads, D).transpose(0, 2, 1, 3)
        k = k.reshape(B, S, heads, D).transpose(0, 2, 1, 3)
        v = v.reshape(B, S, heads, D).transpose(0, 2, 1, 3)
        s = jnp.einsum("bhqd,bhkd->bhqk", q, k) / math.sqrt(D) + bias
        a = jax.nn.softmax(s, axis=-1)
        o = jnp.einsum("bhqk,bhkd->bhqd", a, v).transpose(0, 2, 1, 3).reshape(B, S, W)
        x = x + (o @ p["w_out"] + p["b_out"])
        h2 = _ref_layer_norm(x, p["ln2_g"], p["ln2_b"])
        fc = _gelu_exact(h2 @ p["w_fc"] + p["b_fc"])
        x = x + (fc @ p["w_pj"] + p["b_pj"])
    return x


if __name__ == "__main__":
    width, heads, layers = 32, 4, 2
    B, S = 2, 8

    key = jax.random.PRNGKey(0)
    kx, kp = jax.random.split(key)
    x = jax.random.normal(kx, (B, S, width), jnp.float32)
    # second sequence has its last 2 positions padded
    key_padding_mask = jnp.array(
        [[False] * S,
         [False] * (S - 2) + [True] * 2])

    params = init_params(kp, width, layers)

    fwd = jax.jit(lambda xx, mm: self_attention_blocks(xx, params, heads, mm))
    out = jax.block_until_ready(fwd(x, key_padding_mask))

    ref = ref_forward(x, params, heads, key_padding_mask)
    assert out.shape == (B, S, width)
    max_err = float(jnp.max(jnp.abs(out - ref)))
    # bf16 MXU operands (f32 accumulation) vs. pure-f32 reference -> relaxed tolerance
    if not (max_err < 5e-3):
        raise AssertionError(f"kernel/reference mismatch, max abs err = {max_err}")

    print("KERNEL_OK")
</pallas_src>

<mosaic_0001>
module attributes {stable_mosaic.version = 11 : i64} {
  func.func @_fused_blocks_kernel(%arg0: i32, %arg1: i32, %arg2: memref<1x8x32xf32, #tpu.memory_space<vmem>>, %arg3: memref<1x1x8xf32, #tpu.memory_space<vmem>>, %arg4: memref<1x1x32xf32, #tpu.memory_space<vmem>>, %arg5: memref<1x1x32xf32, #tpu.memory_space<vmem>>, %arg6: memref<1x32x96xbf16, #tpu.memory_space<vmem>>, %arg7: memref<1x1x96xf32, #tpu.memory_space<vmem>>, %arg8: memref<1x4x8x32xbf16, #tpu.memory_space<vmem>>, %arg9: memref<1x1x32xf32, #tpu.memory_space<vmem>>, %arg10: memref<1x1x32xf32, #tpu.memory_space<vmem>>, %arg11: memref<1x1x32xf32, #tpu.memory_space<vmem>>, %arg12: memref<1x32x128xbf16, #tpu.memory_space<vmem>>, %arg13: memref<1x1x128xf32, #tpu.memory_space<vmem>>, %arg14: memref<1x128x32xbf16, #tpu.memory_space<vmem>>, %arg15: memref<1x1x32xf32, #tpu.memory_space<vmem>>, %arg16: memref<1x8x32xf32, #tpu.memory_space<vmem>>, %arg17: memref<8x32xf32, #tpu.memory_space<vmem>>) attributes {dimension_semantics = [#tpu.dimension_semantics<parallel>, #tpu.dimension_semantics<arbitrary>], iteration_bounds = array<i64: 2, 2>, scalar_prefetch = 0 : i64, scratch_operands = 1 : i64, tpu.core_type = #tpu.core_type<tc>, window_params = [{transform_indices = @transform_0, window_bounds = array<i64: 1, 8, 32>}, {transform_indices = @transform_1, window_bounds = array<i64: 1, 1, 8>}, {transform_indices = @transform_2, window_bounds = array<i64: 1, 1, 32>}, {transform_indices = @transform_3, window_bounds = array<i64: 1, 1, 32>}, {transform_indices = @transform_4, window_bounds = array<i64: 1, 32, 96>}, {transform_indices = @transform_5, window_bounds = array<i64: 1, 1, 96>}, {transform_indices = @transform_6, window_bounds = array<i64: 1, 4, 8, 32>}, {transform_indices = @transform_7, window_bounds = array<i64: 1, 1, 32>}, {transform_indices = @transform_8, window_bounds = array<i64: 1, 1, 32>}, {transform_indices = @transform_9, window_bounds = array<i64: 1, 1, 32>}, {transform_indices = @transform_10, window_bounds = array<i64: 1, 32, 128>}, {transform_indices = @transform_11, window_bounds = array<i64: 1, 1, 128>}, {transform_indices = @transform_12, window_bounds = array<i64: 1, 128, 32>}, {transform_indices = @transform_13, window_bounds = array<i64: 1, 1, 32>}, {transform_indices = @transform_14, window_bounds = array<i64: 1, 8, 32>}]} {
    %c0_i32 = arith.constant 0 : i32
    %0 = arith.cmpi eq, %arg1, %c0_i32 : i32
    %1 = arith.extui %0 : i1 to i32
    %c0_i32_0 = arith.constant 0 : i32
    %2 = arith.cmpi ne, %1, %c0_i32_0 : i32
    scf.if %2 {
      %c0_69 = arith.constant 0 : index
      %c0_70 = arith.constant 0 : index
      %c0_71 = arith.constant 0 : index
      %157 = vector.load %arg2[%c0_69, %c0_70, %c0_71] : memref<1x8x32xf32, #tpu.memory_space<vmem>>, vector<1x8x32xf32>
      %158 = vector.shape_cast %157 : vector<1x8x32xf32> to vector<8x32xf32>
      %c0_72 = arith.constant 0 : index
      %c0_73 = arith.constant 0 : index
      %159 = vector.load %arg17[%c0_72, %c0_73] : memref<8x32xf32, #tpu.memory_space<vmem>>, vector<8x32xf32>
      tpu.vector_store %arg17[%c0_72, %c0_73], %158 {strides = array<i32>} : memref<8x32xf32, #tpu.memory_space<vmem>>, vector<8x32xf32>,
    } else {
    }
    %c0 = arith.constant 0 : index
    %c0_1 = arith.constant 0 : index
    %3 = vector.load %arg17[%c0, %c0_1] : memref<8x32xf32, #tpu.memory_space<vmem>>, vector<8x32xf32>
    %c0_2 = arith.constant 0 : index
    %c0_3 = arith.constant 0 : index
    %c0_4 = arith.constant 0 : index
    %4 = vector.load %arg3[%c0_2, %c0_3, %c0_4] : memref<1x1x8xf32, #tpu.memory_space<vmem>>, vector<1x1x8xf32>
    %5 = vector.shape_cast %4 : vector<1x1x8xf32> to vector<1x8xf32>
    %c0_5 = arith.constant 0 : index
    %c0_6 = arith.constant 0 : index
    %c0_7 = arith.constant 0 : index
    %6 = vector.load %arg4[%c0_5, %c0_6, %c0_7] : memref<1x1x32xf32, #tpu.memory_space<vmem>>, vector<1x1x32xf32>
    %7 = vector.shape_cast %6 : vector<1x1x32xf32> to vector<1x32xf32>
    %c0_8 = arith.constant 0 : index
    %c0_9 = arith.constant 0 : index
    %c0_10 = arith.constant 0 : index
    %8 = vector.load %arg5[%c0_8, %c0_9, %c0_10] : memref<1x1x32xf32, #tpu.memory_space<vmem>>, vector<1x1x32xf32>
    %9 = vector.shape_cast %8 : vector<1x1x32xf32> to vector<1x32xf32>
    %cst = arith.constant dense<0.000000e+00> : vector<8xf32>
    %10 = vector.multi_reduction <add>, %3, %cst [1] : vector<8x32xf32> to vector<8xf32>
    %11 = vector.shape_cast %10 : vector<8xf32> to vector<8x1xf32>
    %cst_11 = arith.constant 3.200000e+01 : f32
    %12 = vector.broadcast %cst_11 : f32 to vector<8x1xf32>
    %13 = arith.divf %11, %12 : vector<8x1xf32>
    %14 = arith.mulf %3, %3 : vector<8x32xf32>
    %cst_12 = arith.constant dense<0.000000e+00> : vector<8xf32>
    %15 = vector.multi_reduction <add>, %14, %cst_12 [1] : vector<8x32xf32> to vector<8xf32>
    %16 = vector.shape_cast %15 : vector<8xf32> to vector<8x1xf32>
    %cst_13 = arith.constant 3.200000e+01 : f32
    %17 = vector.broadcast %cst_13 : f32 to vector<8x1xf32>
    %18 = arith.divf %16, %17 : vector<8x1xf32>
    %19 = arith.mulf %13, %13 : vector<8x1xf32>
    %20 = arith.subf %18, %19 : vector<8x1xf32>
    %cst_14 = arith.constant 0.000000e+00 : f32
    %21 = vector.broadcast %cst_14 : f32 to vector<8x1xf32>
    %22 = arith.maximumf %20, %21 : vector<8x1xf32>
    %23 = vector.broadcast %13 : vector<8x1xf32> to vector<8x32xf32>
    %24 = arith.subf %3, %23 : vector<8x32xf32>
    %cst_15 = arith.constant 9.99999974E-6 : f32
    %25 = vector.broadcast %cst_15 : f32 to vector<8x1xf32>
    %26 = arith.addf %22, %25 : vector<8x1xf32>
    %27 = math.rsqrt %26 : vector<8x1xf32>
    %28 = vector.broadcast %27 : vector<8x1xf32> to vector<8x32xf32>
    %29 = arith.mulf %24, %28 : vector<8x32xf32>
    %30 = vector.broadcast %7 : vector<1x32xf32> to vector<8x32xf32>
    %31 = arith.mulf %29, %30 : vector<8x32xf32>
    %32 = vector.broadcast %9 : vector<1x32xf32> to vector<8x32xf32>
    %33 = arith.addf %31, %32 : vector<8x32xf32>
    %34 = arith.truncf %33 : vector<8x32xf32> to vector<8x32xbf16>
    %c0_16 = arith.constant 0 : index
    %c0_17 = arith.constant 0 : index
    %c0_18 = arith.constant 0 : index
    %35 = vector.load %arg6[%c0_16, %c0_17, %c0_18] : memref<1x32x96xbf16, #tpu.memory_space<vmem>>, vector<1x32x96xbf16>
    %36 = vector.shape_cast %35 : vector<1x32x96xbf16> to vector<32x96xbf16>
    %cst_19 = arith.constant dense<0.000000e+00> : vector<8x96xf32>
    %37 = tpu.matmul %34, %36, %cst_19 {dimension_numbers = #tpu.dot_dimension_numbers<[1], [0], [0], [1], [0, 0, 1, 1], [], []>} : vector<8x32xbf16>, vector<32x96xbf16>, vector<8x96xf32> -> vector<8x96xf32>
    %c0_20 = arith.constant 0 : index
    %c0_21 = arith.constant 0 : index
    %c0_22 = arith.constant 0 : index
    %38 = vector.load %arg7[%c0_20, %c0_21, %c0_22] : memref<1x1x96xf32, #tpu.memory_space<vmem>>, vector<1x1x96xf32>
    %39 = vector.shape_cast %38 : vector<1x1x96xf32> to vector<1x96xf32>
    %40 = vector.broadcast %39 : vector<1x96xf32> to vector<8x96xf32>
    %41 = arith.addf %37, %40 : vector<8x96xf32>
    %42 = vector.extract_strided_slice %41 {offsets = [0, 0], sizes = [8, 8], strides = [1, 1]} : vector<8x96xf32> to vector<8x8xf32>
    %43 = vector.extract_strided_slice %41 {offsets = [0, 8], sizes = [8, 8], strides = [1, 1]} : vector<8x96xf32> to vector<8x8xf32>
    %44 = vector.extract_strided_slice %41 {offsets = [0, 16], sizes = [8, 8], strides = [1, 1]} : vector<8x96xf32> to vector<8x8xf32>
    %45 = vector.extract_strided_slice %41 {offsets = [0, 24], sizes = [8, 8], strides = [1, 1]} : vector<8x96xf32> to vector<8x8xf32>
    %46 = vector.shape_cast %42 : vector<8x8xf32> to vector<1x8x8xf32>
    %47 = vector.shape_cast %43 : vector<8x8xf32> to vector<1x8x8xf32>
    %48 = vector.shape_cast %44 : vector<8x8xf32> to vector<1x8x8xf32>
    %49 = vector.shape_cast %45 : vector<8x8xf32> to vector<1x8x8xf32>
    %50 = tpu.concatenate %46, %47, %48, %49 in 0 : vector<1x8x8xf32>, vector<1x8x8xf32>, vector<1x8x8xf32>, vector<1x8x8xf32> -> vector<4x8x8xf32>
    %cst_23 = arith.constant 0.353553385 : f32
    %51 = vector.broadcast %cst_23 : f32 to vector<4x8x8xf32>
    %52 = arith.mulf %50, %51 : vector<4x8x8xf32>
    %53 = arith.truncf %52 : vector<4x8x8xf32> to vector<4x8x8xbf16>
    %54 = vector.extract_strided_slice %41 {offsets = [0, 32], sizes = [8, 8], strides = [1, 1]} : vector<8x96xf32> to vector<8x8xf32>
    %55 = vector.extract_strided_slice %41 {offsets = [0, 40], sizes = [8, 8], strides = [1, 1]} : vector<8x96xf32> to vector<8x8xf32>
    %56 = vector.extract_strided_slice %41 {offsets = [0, 48], sizes = [8, 8], strides = [1, 1]} : vector<8x96xf32> to vector<8x8xf32>
    %57 = vector.extract_strided_slice %41 {offsets = [0, 56], sizes = [8, 8], strides = [1, 1]} : vector<8x96xf32> to vector<8x8xf32>
    %58 = vector.shape_cast %54 : vector<8x8xf32> to vector<1x8x8xf32>
    %59 = vector.shape_cast %55 : vector<8x8xf32> to vector<1x8x8xf32>
    %60 = vector.shape_cast %56 : vector<8x8xf32> to vector<1x8x8xf32>
    %61 = vector.shape_cast %57 : vector<8x8xf32> to vector<1x8x8xf32>
    %62 = tpu.concatenate %58, %59, %60, %61 in 0 : vector<1x8x8xf32>, vector<1x8x8xf32>, vector<1x8x8xf32>, vector<1x8x8xf32> -> vector<4x8x8xf32>
    %63 = arith.truncf %62 : vector<4x8x8xf32> to vector<4x8x8xbf16>
    %64 = vector.extract_strided_slice %41 {offsets = [0, 64], sizes = [8, 8], strides = [1, 1]} : vector<8x96xf32> to vector<8x8xf32>
    %65 = vector.extract_strided_slice %41 {offsets = [0, 72], sizes = [8, 8], strides = [1, 1]} : vector<8x96xf32> to vector<8x8xf32>
    %66 = vector.extract_strided_slice %41 {offsets = [0, 80], sizes = [8, 8], strides = [1, 1]} : vector<8x96xf32> to vector<8x8xf32>
    %67 = vector.extract_strided_slice %41 {offsets = [0, 88], sizes = [8, 8], strides = [1, 1]} : vector<8x96xf32> to vector<8x8xf32>
    %68 = vector.shape_cast %64 : vector<8x8xf32> to vector<1x8x8xf32>
    %69 = vector.shape_cast %65 : vector<8x8xf32> to vector<1x8x8xf32>
    %70 = vector.shape_cast %66 : vector<8x8xf32> to vector<1x8x8xf32>
    %71 = vector.shape_cast %67 : vector<8x8xf32> to vector<1x8x8xf32>
    %72 = tpu.concatenate %68, %69, %70, %71 in 0 : vector<1x8x8xf32>, vector<1x8x8xf32>, vector<1x8x8xf32>, vector<1x8x8xf32> -> vector<4x8x8xf32>
    %73 = arith.truncf %72 : vector<4x8x8xf32> to vector<4x8x8xbf16>
    "tpu.trace_start"() <{level = 10 : i32, message = "hqd,hkd->hqk"}> : () -> ()
    %cst_24 = arith.constant dense<0.000000e+00> : vector<4x8x8xf32>
    %74 = tpu.matmul %53, %63, %cst_24 {dimension_numbers = #tpu.dot_dimension_numbers<[2], [2], [1], [1], [0, 0, 0, 1, 1, 1], [0], [0]>} : vector<4x8x8xbf16>, vector<4x8x8xbf16>, vector<4x8x8xf32> -> vector<4x8x8xf32>
    "tpu.trace_stop"() : () -> ()
    %75 = vector.shape_cast %5 : vector<1x8xf32> to vector<1x1x8xf32>
    %76 = vector.broadcast %75 : vector<1x1x8xf32> to vector<4x8x8xf32>
    %77 = arith.addf %74, %76 : vector<4x8x8xf32>
    %cst_25 = arith.constant dense<0xFF800000> : vector<4x8xf32>
    %78 = vector.multi_reduction <maximumf>, %77, %cst_25 [2] : vector<4x8x8xf32> to vector<4x8xf32>
    %79 = vector.shape_cast %78 : vector<4x8xf32> to vector<4x8x1xf32>
    %80 = vector.broadcast %79 : vector<4x8x1xf32> to vector<4x8x8xf32>
    %81 = arith.subf %77, %80 : vector<4x8x8xf32>
    %82 = math.exp %81 : vector<4x8x8xf32>
    %cst_26 = arith.constant dense<0.000000e+00> : vector<4x8xf32>
    %83 = vector.multi_reduction <add>, %82, %cst_26 [2] : vector<4x8x8xf32> to vector<4x8xf32>
    %84 = vector.shape_cast %83 : vector<4x8xf32> to vector<4x8x1xf32>
    %85 = tpu.reciprocal %84 {approx = true} : vector<4x8x1xf32> -> vector<4x8x1xf32>
    %86 = vector.broadcast %85 : vector<4x8x1xf32> to vector<4x8x8xf32>
    %87 = arith.mulf %82, %86 : vector<4x8x8xf32>
    %88 = arith.truncf %87 : vector<4x8x8xf32> to vector<4x8x8xbf16>
    "tpu.trace_start"() <{level = 10 : i32, message = "hqk,hkd->hqd"}> : () -> ()
    %cst_27 = arith.constant dense<0.000000e+00> : vector<4x8x8xf32>
    %89 = tpu.matmul %88, %73, %cst_27 {dimension_numbers = #tpu.dot_dimension_numbers<[2], [1], [1], [2], [0, 0, 0, 1, 1, 2], [0], [0]>} : vector<4x8x8xbf16>, vector<4x8x8xbf16>, vector<4x8x8xf32> -> vector<4x8x8xf32>
    "tpu.trace_stop"() : () -> ()
    %90 = arith.truncf %89 : vector<4x8x8xf32> to vector<4x8x8xbf16>
    %c0_28 = arith.constant 0 : index
    %c0_29 = arith.constant 0 : index
    %c0_30 = arith.constant 0 : index
    %c0_31 = arith.constant 0 : index
    %91 = vector.load %arg8[%c0_28, %c0_29, %c0_30, %c0_31] : memref<1x4x8x32xbf16, #tpu.memory_space<vmem>>, vector<1x4x8x32xbf16>
    %92 = vector.shape_cast %91 : vector<1x4x8x32xbf16> to vector<4x8x32xbf16>
    "tpu.trace_start"() <{level = 10 : i32, message = "hsd,hdw->hsw"}> : () -> ()
    %cst_32 = arith.constant dense<0.000000e+00> : vector<4x8x32xf32>
    %93 = tpu.matmul %90, %92, %cst_32 {dimension_numbers = #tpu.dot_dimension_numbers<[2], [1], [1], [2], [0, 0, 0, 1, 1, 2], [0], [0]>} : vector<4x8x8xbf16>, vector<4x8x32xbf16>, vector<4x8x32xf32> -> vector<4x8x32xf32>
    "tpu.trace_stop"() : () -> ()
    %cst_33 = arith.constant dense<0.000000e+00> : vector<8x32xf32>
    %94 = vector.multi_reduction <add>, %93, %cst_33 [0] : vector<4x8x32xf32> to vector<8x32xf32>
    %c0_34 = arith.constant 0 : index
    %c0_35 = arith.constant 0 : index
    %c0_36 = arith.constant 0 : index
    %95 = vector.load %arg9[%c0_34, %c0_35, %c0_36] : memref<1x1x32xf32, #tpu.memory_space<vmem>>, vector<1x1x32xf32>
    %96 = vector.shape_cast %95 : vector<1x1x32xf32> to vector<1x32xf32>
    %97 = vector.broadcast %96 : vector<1x32xf32> to vector<8x32xf32>
    %98 = arith.addf %94, %97 : vector<8x32xf32>
    %99 = arith.addf %3, %98 : vector<8x32xf32>
    %c0_37 = arith.constant 0 : index
    %c0_38 = arith.constant 0 : index
    %c0_39 = arith.constant 0 : index
    %100 = vector.load %arg10[%c0_37, %c0_38, %c0_39] : memref<1x1x32xf32, #tpu.memory_space<vmem>>, vector<1x1x32xf32>
    %101 = vector.shape_cast %100 : vector<1x1x32xf32> to vector<1x32xf32>
    %c0_40 = arith.constant 0 : index
    %c0_41 = arith.constant 0 : index
    %c0_42 = arith.constant 0 : index
    %102 = vector.load %arg11[%c0_40, %c0_41, %c0_42] : memref<1x1x32xf32, #tpu.memory_space<vmem>>, vector<1x1x32xf32>
    %103 = vector.shape_cast %102 : vector<1x1x32xf32> to vector<1x32xf32>
    %cst_43 = arith.constant dense<0.000000e+00> : vector<8xf32>
    %104 = vector.multi_reduction <add>, %99, %cst_43 [1] : vector<8x32xf32> to vector<8xf32>
    %105 = vector.shape_cast %104 : vector<8xf32> to vector<8x1xf32>
    %cst_44 = arith.constant 3.200000e+01 : f32
    %106 = vector.broadcast %cst_44 : f32 to vector<8x1xf32>
    %107 = arith.divf %105, %106 : vector<8x1xf32>
    %108 = arith.mulf %99, %99 : vector<8x32xf32>
    %cst_45 = arith.constant dense<0.000000e+00> : vector<8xf32>
    %109 = vector.multi_reduction <add>, %108, %cst_45 [1] : vector<8x32xf32> to vector<8xf32>
    %110 = vector.shape_cast %109 : vector<8xf32> to vector<8x1xf32>
    %cst_46 = arith.constant 3.200000e+01 : f32
    %111 = vector.broadcast %cst_46 : f32 to vector<8x1xf32>
    %112 = arith.divf %110, %111 : vector<8x1xf32>
    %113 = arith.mulf %107, %107 : vector<8x1xf32>
    %114 = arith.subf %112, %113 : vector<8x1xf32>
    %cst_47 = arith.constant 0.000000e+00 : f32
    %115 = vector.broadcast %cst_47 : f32 to vector<8x1xf32>
    %116 = arith.maximumf %114, %115 : vector<8x1xf32>
    %117 = vector.broadcast %107 : vector<8x1xf32> to vector<8x32xf32>
    %118 = arith.subf %99, %117 : vector<8x32xf32>
    %cst_48 = arith.constant 9.99999974E-6 : f32
    %119 = vector.broadcast %cst_48 : f32 to vector<8x1xf32>
    %120 = arith.addf %116, %119 : vector<8x1xf32>
    %121 = math.rsqrt %120 : vector<8x1xf32>
    %122 = vector.broadcast %121 : vector<8x1xf32> to vector<8x32xf32>
    %123 = arith.mulf %118, %122 : vector<8x32xf32>
    %124 = vector.broadcast %101 : vector<1x32xf32> to vector<8x32xf32>
    %125 = arith.mulf %123, %124 : vector<8x32xf32>
    %126 = vector.broadcast %103 : vector<1x32xf32> to vector<8x32xf32>
    %127 = arith.addf %125, %126 : vector<8x32xf32>
    %128 = arith.truncf %127 : vector<8x32xf32> to vector<8x32xbf16>
    %c0_49 = arith.constant 0 : index
    %c0_50 = arith.constant 0 : index
    %c0_51 = arith.constant 0 : index
    %129 = vector.load %arg12[%c0_49, %c0_50, %c0_51] : memref<1x32x128xbf16, #tpu.memory_space<vmem>>, vector<1x32x128xbf16>
    %130 = vector.shape_cast %129 : vector<1x32x128xbf16> to vector<32x128xbf16>
    %cst_52 = arith.constant dense<0.000000e+00> : vector<8x128xf32>
    %131 = tpu.matmul %128, %130, %cst_52 {dimension_numbers = #tpu.dot_dimension_numbers<[1], [0], [0], [1], [0, 0, 1, 1], [], []>} : vector<8x32xbf16>, vector<32x128xbf16>, vector<8x128xf32> -> vector<8x128xf32>
    %c0_53 = arith.constant 0 : index
    %c0_54 = arith.constant 0 : index
    %c0_55 = arith.constant 0 : index
    %132 = vector.load %arg13[%c0_53, %c0_54, %c0_55] : memref<1x1x128xf32, #tpu.memory_space<vmem>>, vector<1x1x128xf32>
    %133 = vector.shape_cast %132 : vector<1x1x128xf32> to vector<1x128xf32>
    %134 = vector.broadcast %133 : vector<1x128xf32> to vector<8x128xf32>
    %135 = arith.addf %131, %134 : vector<8x128xf32>
    %cst_56 = arith.constant 5.000000e-01 : f32
    %136 = vector.broadcast %cst_56 : f32 to vector<8x128xf32>
    %137 = arith.mulf %136, %135 : vector<8x128xf32>
    %cst_57 = arith.constant 0.707106769 : f32
    %138 = vector.broadcast %cst_57 : f32 to vector<8x128xf32>
    %139 = arith.mulf %135, %138 : vector<8x128xf32>
    %140 = math.erf %139 : vector<8x128xf32>
    %cst_58 = arith.constant 1.000000e+00 : f32
    %141 = vector.broadcast %cst_58 : f32 to vector<8x128xf32>
    %142 = arith.addf %141, %140 : vector<8x128xf32>
    %143 = arith.mulf %137, %142 : vector<8x128xf32>
    %144 = arith.truncf %143 : vector<8x128xf32> to vector<8x128xbf16>
    %c0_59 = arith.constant 0 : index
    %c0_60 = arith.constant 0 : index
    %c0_61 = arith.constant 0 : index
    %145 = vector.load %arg14[%c0_59, %c0_60, %c0_61] : memref<1x128x32xbf16, #tpu.memory_space<vmem>>, vector<1x128x32xbf16>
    %146 = vector.shape_cast %145 : vector<1x128x32xbf16> to vector<128x32xbf16>
    %cst_62 = arith.constant dense<0.000000e+00> : vector<8x32xf32>
    %147 = tpu.matmul %144, %146, %cst_62 {dimension_numbers = #tpu.dot_dimension_numbers<[1], [0], [0], [1], [0, 0, 1, 1], [], []>} : vector<8x128xbf16>, vector<128x32xbf16>, vector<8x32xf32> -> vector<8x32xf32>
    %c0_63 = arith.constant 0 : index
    %c0_64 = arith.constant 0 : index
    %c0_65 = arith.constant 0 : index
    %148 = vector.load %arg15[%c0_63, %c0_64, %c0_65] : memref<1x1x32xf32, #tpu.memory_space<vmem>>, vector<1x1x32xf32>
    %149 = vector.shape_cast %148 : vector<1x1x32xf32> to vector<1x32xf32>
    %150 = vector.broadcast %149 : vector<1x32xf32> to vector<8x32xf32>
    %151 = arith.addf %147, %150 : vector<8x32xf32>
    %152 = arith.addf %99, %151 : vector<8x32xf32>
    %c0_66 = arith.constant 0 : index
    %c0_67 = arith.constant 0 : index
    %153 = vector.load %arg17[%c0_66, %c0_67] : memref<8x32xf32, #tpu.memory_space<vmem>>, vector<8x32xf32>
    tpu.vector_store %arg17[%c0_66, %c0_67], %152 {strides = array<i32>} : memref<8x32xf32, #tpu.memory_space<vmem>>, vector<8x32xf32>,
    %c1_i32 = arith.constant 1 : i32
    %154 = arith.cmpi eq, %arg1, %c1_i32 : i32
    %155 = arith.extui %154 : i1 to i32
    %c0_i32_68 = arith.constant 0 : i32
    %156 = arith.cmpi ne, %155, %c0_i32_68 : i32
    scf.if %156 {
      %c0_69 = arith.constant 0 : index
      %c0_70 = arith.constant 0 : index
      %c0_71 = arith.constant 0 : index
      %157 = vector.load %arg16[%c0_69, %c0_70, %c0_71] : memref<1x8x32xf32, #tpu.memory_space<vmem>>, vector<1x8x32xf32>
      %158 = vector.shape_cast %157 : vector<1x8x32xf32> to vector<8x32xf32>
      %159 = vector.shape_cast %152 : vector<8x32xf32> to vector<1x8x32xf32>
      tpu.vector_store %arg16[%c0_69, %c0_70, %c0_71], %159 {strides = array<i32>} : memref<1x8x32xf32, #tpu.memory_space<vmem>>, vector<1x8x32xf32>,
    } else {
    }
    return
  }
  func.func @transform_0(%arg0: i32, %arg1: i32) -> (i32, i32, i32) {
    %c0_i32 = arith.constant 0 : i32
    %c0_i32_0 = arith.constant 0 : i32
    %c0_i32_1 = arith.constant 0 : i32
    return %arg0, %c0_i32, %c0_i32_0 : i32, i32, i32
  }
  func.func @transform_1(%arg0: i32, %arg1: i32) -> (i32, i32, i32) {
    %c0_i32 = arith.constant 0 : i32
    %c0_i32_0 = arith.constant 0 : i32
    %c0_i32_1 = arith.constant 0 : i32
    return %arg0, %c0_i32, %c0_i32_0 : i32, i32, i32
  }
  func.func @transform_2(%arg0: i32, %arg1: i32) -> (i32, i32, i32) {
    %c0_i32 = arith.constant 0 : i32
    %c0_i32_0 = arith.constant 0 : i32
    %c0_i32_1 = arith.constant 0 : i32
    return %arg1, %c0_i32, %c0_i32_0 : i32, i32, i32
  }
  func.func @transform_3(%arg0: i32, %arg1: i32) -> (i32, i32, i32) {
    %c0_i32 = arith.constant 0 : i32
    %c0_i32_0 = arith.constant 0 : i32
    %c0_i32_1 = arith.constant 0 : i32
    return %arg1, %c0_i32, %c0_i32_0 : i32, i32, i32
  }
  func.func @transform_4(%arg0: i32, %arg1: i32) -> (i32, i32, i32) {
    %c0_i32 = arith.constant 0 : i32
    %c0_i32_0 = arith.constant 0 : i32
    %c0_i32_1 = arith.constant 0 : i32
    return %arg1, %c0_i32, %c0_i32_0 : i32, i32, i32
  }
  func.func @transform_5(%arg0: i32, %arg1: i32) -> (i32, i32, i32) {
    %c0_i32 = arith.constant 0 : i32
    %c0_i32_0 = arith.constant 0 : i32
    %c0_i32_1 = arith.constant 0 : i32
    return %arg1, %c0_i32, %c0_i32_0 : i32, i32, i32
  }
  func.func @transform_6(%arg0: i32, %arg1: i32) -> (i32, i32, i32, i32) {
    %c0_i32 = arith.constant 0 : i32
    %c0_i32_0 = arith.constant 0 : i32
    %c0_i32_1 = arith.constant 0 : i32
    %c0_i32_2 = arith.constant 0 : i32
    return %arg1, %c0_i32, %c0_i32_0, %c0_i32_1 : i32, i32, i32, i32
  }
  func.func @transform_7(%arg0: i32, %arg1: i32) -> (i32, i32, i32) {
    %c0_i32 = arith.constant 0 : i32
    %c0_i32_0 = arith.constant 0 : i32
    %c0_i32_1 = arith.constant 0 : i32
    return %arg1, %c0_i32, %c0_i32_0 : i32, i32, i32
  }
  func.func @transform_8(%arg0: i32, %arg1: i32) -> (i32, i32, i32) {
    %c0_i32 = arith.constant 0 : i32
    %c0_i32_0 = arith.constant 0 : i32
    %c0_i32_1 = arith.constant 0 : i32
    return %arg1, %c0_i32, %c0_i32_0 : i32, i32, i32
  }
  func.func @transform_9(%arg0: i32, %arg1: i32) -> (i32, i32, i32) {
    %c0_i32 = arith.constant 0 : i32
    %c0_i32_0 = arith.constant 0 : i32
    %c0_i32_1 = arith.constant 0 : i32
    return %arg1, %c0_i32, %c0_i32_0 : i32, i32, i32
  }
  func.func @transform_10(%arg0: i32, %arg1: i32) -> (i32, i32, i32) {
    %c0_i32 = arith.constant 0 : i32
    %c0_i32_0 = arith.constant 0 : i32
    %c0_i32_1 = arith.constant 0 : i32
    return %arg1, %c0_i32, %c0_i32_0 : i32, i32, i32
  }
  func.func @transform_11(%arg0: i32, %arg1: i32) -> (i32, i32, i32) {
    %c0_i32 = arith.constant 0 : i32
    %c0_i32_0 = arith.constant 0 : i32
    %c0_i32_1 = arith.constant 0 : i32
    return %arg1, %c0_i32, %c0_i32_0 : i32, i32, i32
  }
  func.func @transform_12(%arg0: i32, %arg1: i32) -> (i32, i32, i32) {
    %c0_i32 = arith.constant 0 : i32
    %c0_i32_0 = arith.constant 0 : i32
    %c0_i32_1 = arith.constant 0 : i32
    return %arg1, %c0_i32, %c0_i32_0 : i32, i32, i32
  }
  func.func @transform_13(%arg0: i32, %arg1: i32) -> (i32, i32, i32) {
    %c0_i32 = arith.constant 0 : i32
    %c0_i32_0 = arith.constant 0 : i32
    %c0_i32_1 = arith.constant 0 : i32
    return %arg1, %c0_i32, %c0_i32_0 : i32, i32, i32
  }
  func.func @transform_14(%arg0: i32, %arg1: i32) -> (i32, i32, i32) {
    %c0_i32 = arith.constant 0 : i32
    %c0_i32_0 = arith.constant 0 : i32
    %c0_i32_1 = arith.constant 0 : i32
    return %arg0, %c0_i32, %c0_i32_0 : i32, i32, i32
  }
}

</mosaic_0001>

<bundles_post_ra>
// kernel: _lambda_.1
= control target key start
LH: loop header
LB: loop body
LE: loop exit
PB: predicated region body
PF: predicated region fallthrough
CT: control target
= control target key end

     0   :  { %s3275_s0 = inlined_call_operand.hbm [shape: f32[2,8,32], index: 0, kind: input, shape index: {}, may-alias: {0,14}]   ;;  %s3276_s1 = inlined_call_operand.vmem [shape: f32[2,1,8], index: 1, kind: input, shape index: {}]   ;;  %s3277_s2 = inlined_call_operand.vmem [shape: f32[2,1,32], index: 2, kind: input, shape index: {}, may-alias: {2,8}]   ;;  %s3278_s3 = inlined_call_operand.vmem [shape: f32[2,1,32], index: 3, kind: input, shape index: {}, may-alias: {3,9}]   ;;  %s3279_s4 = inlined_call_operand.vmem [shape: bf16[2,32,96], index: 4, kind: input, shape index: {}]   ;;  %s3280_s5 = inlined_call_operand.vmem [shape: f32[2,1,96], index: 5, kind: input, shape index: {}]   ;;  %s3281_s6 = inlined_call_operand.hbm [shape: bf16[2,4,8,32], index: 6, kind: input, shape index: {}]   ;;  %s3282_s7 = inlined_call_operand.vmem [shape: f32[2,1,32], index: 7, kind: input, shape index: {}]   ;;  %s3283_s8 = inlined_call_operand.vmem [shape: f32[2,1,32], index: 8, kind: input, shape index: {}, may-alias: {2,8}]   ;;  %s3284_s9 = inlined_call_operand.vmem [shape: f32[2,1,32], index: 9, kind: input, shape index: {}, may-alias: {3,9}]   ;;  %s3285_s10 = inlined_call_operand.vmem [shape: bf16[2,32,128], index: 10, kind: input, shape index: {}]   ;;  %s3286_s11 = inlined_call_operand.vmem [shape: f32[2,1,128], index: 11, kind: input, shape index: {}]   ;;  %s3287_s12 = inlined_call_operand.hbm [shape: bf16[2,128,32], index: 12, kind: input, shape index: {}]   ;;  %s3288_s13 = inlined_call_operand.vmem [shape: f32[2,1,32], index: 13, kind: input, shape index: {}]   ;;  %s3289_s14 = inlined_call_operand.hbm [shape: f32[2,8,32], index: 14, kind: output, shape index: {}, may-alias: {0,14}]  }
   0x1   :  { %3314 = sst [smem:[#allocation28_spill]] %s3275_s0 }
   0x2   :  { %3315 = sst [smem:[#allocation29_spill]] %s3276_s1 }
   0x3   :  { %3316 = sst [smem:[#allocation30_spill]] %s3277_s2 }
   0x4   :  { %3317 = sst [smem:[#allocation31_spill]] %s3278_s3 }
   0x5   :  { %3318 = sst [smem:[#allocation32_spill]] %s3279_s4 }
   0x6   :  { %3319 = sst [smem:[#allocation33_spill]] %s3280_s5 }
   0x7   :  { %3320 = sst [smem:[#allocation34_spill]] %s3281_s6 }
   0x8   :  { %3321 = sst [smem:[#allocation35_spill]] %s3282_s7 }
   0x9   :  { %3322 = sst [smem:[#allocation36_spill]] %s3283_s8 }
   0xa   :  { %3323 = sst [smem:[#allocation37_spill]] %s3284_s9 }
   0xb   :  { %3324 = sst [smem:[#allocation38_spill]] %s3285_s10 }
   0xc   :  { %3325 = sst [smem:[#allocation39_spill]] %s3286_s11 }
   0xd   :  { %3326 = sst [smem:[#allocation40_spill]] %s3287_s12 }
   0xe   :  { %3327 = sst [smem:[#allocation41_spill]] %s3288_s13 }
   0xf   :  { %3328 = sst [smem:[#allocation42_spill]] %s3289_s14 }
  0x10   :  { %19 = vsyncpa [#allocation4], 0 }
  0x11   :  { %21 = vsyncpa [#allocation4 + $0x1], 0 }
  0x12   :  { %22 = vsyncpa [#allocation7], 0 }
  0x13   :  { %24 = vsyncpa [#allocation7 + $0x1], 0 }
  0x14   :  { %25 = vsyncpa [#allocation5], 0 }
  0x15   :  { %27 = vsyncpa [#allocation5 + $0x1], 0  ;;  %s2663_s29 = smov 0   ;;  %s2665_s30 = smov 0  }
  0x16   :  { %s2667_s15 = smov 0   ;;  %s2669_s16 = smov 0  }
  0x17   :  { %s2671_s17 = smov 0   ;;  %s2673_s18 = smov 0  }
  0x18   :  { %s2675_s19 = smov 0   ;;  %s2677_s20 = smov 0  }
  0x19   :  { %s2679_s21 = smov 0   ;;  %s2681_s22 = smov 0  }
  0x1a   :  { %s2683_s23 = smov 0  }
  0x1b LB: > { %3329 = sst [smem:[#allocation13_spill]] %s2537_s30  ;;  %p60_p0 = scmp.eq.s32.totalorder %s2573_s23, 0  ;;  %s2573_s23 = sphi %s2683_s23, %s33_s23   ;;  %s2569_s22 = sphi %s2681_s22, %s3411_s22   ;;  %s2565_s21 = sphi %s2679_s21, %s3410_s21   ;;  %s2561_s20 = sphi %s2677_s20, %s3409_s20   ;;  %s2557_s19 = sphi %s2675_s19, %s3408_s19   ;;  %s2553_s18 = sphi %s2673_s18, %s3407_s18   ;;  %s2549_s17 = sphi %s2671_s17, %s3406_s17   ;;  %s2545_s16 = sphi %s2669_s16, %s3405_s16   ;;  %s2541_s15 = sphi %s2667_s15, %s3404_s15   ;;  %s2537_s30 = sphi %s2665_s30, %s3403_s30   ;;  %s2533_s29 = sphi %s2663_s29, %s3402_s29  }
  0x1c   : > { %3330 = sst [smem:[#allocation14_spill]] %s2541_s15  ;;  %p215_p1 = scmp.ne.s32.totalorder %s2541_s15, %s2537_s30 }
  0x1d   : > { %3331 = sst [smem:[#allocation15_spill]] %s2545_s16  ;;  %p3291_p4 = scmp.lt.s32.totalorder %s2573_s23, 4 }
  0x1e   : > { %3332 = sst [smem:[#allocation16_spill]] %s2549_s17  ;;  %p217_p3 = por %p215_p1, %p60_p0 }
  0x1f   : > { %3333 = sst [smem:[#allocation17_spill]] %s2553_s18  ;;  %s503_s26 = sand.u32 1, %s2573_s23  }
  0x20   : > { %3334 = sst [smem:[#allocation18_spill]] %s2557_s19  ;;  %s505_s27 = sand.u32 1, %s2541_s15  }
  0x21   : > { %3335 = sst [smem:[#allocation19_spill]] %s2565_s21  ;;  %s1995_s28 = sshll.u32 %s505_s27, 4 }
  0x22   : > { %3336 = sst [smem:[#allocation20_spill]] %s2569_s22  ;;  %s2051_s14 = sshll.u32 %s2565_s21, 8 }
  0x23   : > { %3337 = sst [smem:[#allocation21_spill]] %s2573_s23  ;;  %s3338_s6 = sld [smem:[#allocation34_spill]] }
  0x24   : > { %s507_s24 = scalar_lea.vmem [#allocation6], %s1995_s28  ;;  %p2740_p5 = pnand %p3291_p4, %p217_p3 }
  0x25   : > { %s514_s25 = sshll.u32 %s507_s24, 4  ;;  %s2744_s8 = sshll.u32 %s505_s27, 6  ;;  %s2736_s25 = int_to_ptr.vmem [resolvable:$true] %s514_s25 }
  0x26   : > { %s2746_s11 = scalar_lea.sflag [#allocation7], %s503_s26  ;;  %p3295_p7 = pneg %p2740_p5 }
  0x29   : > { %s2734_s10 = scalar_lea.hbm %s3338_s6, %s2051_s14  ;;  %s2362_s28 = scalar_lea.hbm %s3338_s6, 512 }
  0x2a   : > { %s2357_s13 = scalar_lea.hbm %s2734_s10, 256  ;;  %p2363_p10 = scmp.lt.u32.totalorder %s2734_s10, %s3338_s6 }
  0x2b   : > { %p2358_p6 = scmp.ne.s32.totalorder %s2734_s10, %s2357_s13  ;;  %p2364_p11 = scmp.lt.u32.totalorder %s2362_s28, %s2357_s13 }
  0x2c   : > { %p2366_p13 = scmp.lt.u32.totalorder %s2357_s13, %s2734_s10 }
  0x2d   : > { %p2360_p8 = pnand %p3295_p7, %p2358_p6  ;;  %p2365_p12 = por %p2364_p11, %p2363_p10 }
  0x2f   : > { %p2361_p9 = pneg %p2360_p8  ;;  %p2367_p1 = por %p2366_p13, %p2365_p12 }
  0x31   : > { %p2368_p3 = pnand %p2367_p1, %p2361_p9 }
  0x33   : > { %2371 = shalt.err (!%p2368_p3)
}
  0x34   : > { %s2372_s26 = scalar_lea.vmem %s2736_s25, 256  ;;  %s2575_s27 = smov [#allocation6]  }
  0x35   : > { %p2373_p6 = scmp.ne.s32.totalorder %s2736_s25, %s2372_s26  ;;  %s2377_s14 = sshll.u32 %s2575_s27, 4  ;;  %s2378_s14 = int_to_ptr.vmem [resolvable:$false] %s2377_s14 }
  0x36   : > { %s2379_s4 = scalar_lea.vmem %s2378_s14, 512  ;;  %p2380_p2 = scmp.lt.s32.totalorder %s2736_s25, %s2378_s14 }
  0x37   : > { %p2375_p8 = pnand %p2373_p6, %p3295_p7  ;;  %p2381_p10 = scmp.lt.s32.totalorder %s2379_s4, %s2372_s26 }
  0x39   : > { %p2376_p4 = pneg %p2375_p8  ;;  %p2382_p11 = por %p2381_p10, %p2380_p2 }
  0x3b   : > { %p2383_p12 = pnand %p2382_p11, %p2376_p4 }
  0x3d   : > { %2386 = shalt.err (!%p2383_p12)
}
  0x3e   : > { %s3292_s7 = smov 64   ;;  %s3293_s13 = smov 4  }
  0x3f   : > { %2216 = dma.hbm_to_vmem [thread:$0]  (!%p2740_p5), %s2734_s10, 256, %s2736_s25, %s2746_s11, %s3292_s7, %s3292_s7, %s3293_s13  }
  0x40   : > { %p2001_p2 = scmp.ge.s32.totalorder %s2573_s23, 1  ;;  %s560_s24 = scalar_lea.vmem [#allocation8], %s2744_s8 }
  0x41   : > { %s2779_s28 = sshll.u32 %s560_s24, 4  ;;  %p581_p4 = scmp.lt.s32.totalorder %s2573_s23, 5  ;;  %s2907_s28 = int_to_ptr.vmem [resolvable:$true] %s2779_s28 }
  0x42   : > { %s2787_s27 = sadd.s32 4294967295, %s2573_s23   ;;  %s1990_s10 = sadd.s32 4294967294, %s2573_s23  }
  0x43   : > { %p2782_p9 = pnand %p2001_p2, %p581_p4  ;;  %s3341_s25 = sadd.s32 1, %s2565_s21 }
  0x44   : > { %p43_p13 = scmp.ge.s32.totalorder %s3341_s25, 2  ;;  %s45_s8 = sadd.s32 1, %s2569_s22 }
  0x45   : > { %s3340_s26 = scalar_select %p2782_p9, 1, 0 }
  0x46   : > { %s52_s14 = sadd.s32 1, %s2553_s18  ;;  %s3342_s4 = smov %s3341_s25 }
  0x47   : > { %s3413_s4 = smov (%p43_p13, %s3342_s4), 0  ;;  %s3415_s8 = smov (!%p43_p13, %s45_s8), %s2569_s22 }
  0x48   : > { %3343 = sst [smem:[#allocation22_spill]] %s3413_s4  ;;  %p59_p1 = scmp.ne.s32.totalorder %s2553_s18, %s2549_s17 }
  0x49   : > { %p65_p3 = scmp.ne.s32.totalorder %s2549_s17, %s2545_s16  ;;  %p47_p6 = scmp.ge.s32.totalorder %s3415_s8, 2 }
  0x4a   : > { %p66_p8 = scmp.eq.s32.totalorder %s2787_s27, 0  ;;  %p2809_p10 = por %p60_p0, %p59_p1 }
  0x4b   : > { %s205_s25 = ssub.s32 %s2565_s21, %s3413_s4  ;;  %s3417_s8 = smov (%p47_p6, %s3415_s8), 0 }
  0x4c   : > { %3345 = sst [smem:[#allocation23_spill]] %s3417_s8  ;;  %p2820_p11 = por %p66_p8, %p65_p3 }
  0x4d   : > { %p206_p12 = scmp.eq.s32.totalorder %s205_s25, 0  ;;  %s49_s13 = ssub.s32 %s2569_s22, %s3417_s8 }
  0x4e   : > { %s3346_s7 = scalar_select %p2820_p11, 1, 0 }
  0x4f   : > { %p3347_p2 = scmp.ne.s32.totalorder %s2537_s30, %s2533_s29  ;;  %p50_p0 = scmp.eq.s32.totalorder %s49_s13, 0 }
  0x50   : > { %p427_p13 = scmp.eq.s32.totalorder %s2787_s27, 3  ;;  %s3349_s4 = sadd.s32 1, %s2541_s15 }
  0x51   : > { %p2829_p4 = por %p3347_p2, %p66_p8  ;;  %p433_p7 = scmp.eq.s32.totalorder %s1990_s10, 3 }
  0x52   : > { %s2837_s5 = scalar_select %p206_p12, %s2541_s15, %s3349_s4  }
  0x53   : > { %s3348_s6 = scalar_select %p2829_p4, 1, 0 }
  0x54   : > { %3350 = sst [smem:[#allocation24_spill]] %s2837_s5  ;;  %p2845_p6 = por %p427_p13, %p59_p1 }
  0x55   : > { %s2840_s3 = scalar_select %p50_p0, %s2553_s18, %s52_s14  }
  0x56   : > { %s3352_s2 = scalar_select %p2845_p6, 1, 0 }
  0x57   : > { %3351 = sst [smem:[#allocation25_spill]] %s2840_s3  ;;  %s453_s25 = sand.u32 1, %s2553_s18  }
  0x58   : > { %3353 = sst [smem:[#allocation26_spill]] %s3352_s2  ;;  %s1994_s29 = sshll.u32 %s2569_s22, 7 }
  0x59   : > { %p2854_p8 = por %p433_p7, %p65_p3  ;;  %s1993_s13 = sshll.u32 %s453_s25, 3 }
  0x5a   : > { %s3356_s0 = sld [smem:[#allocation28_spill]]  ;;  %p3357_p12 = scmp.lt.s32.totalorder %s2573_s23, 4 }
  0x5b   : > { %s3354_s8 = scalar_select %p2854_p8, 1, 0 }
  0x5c   : > { %p2867_p1 = pnand %p3357_p12, %p2809_p10  ;;  %s457_s14 = scalar_lea.vmem [#allocation3], %s1993_s13 }
  0x5d   : > { %3355 = sst [smem:[#allocation27_spill]] %s3354_s8  ;;  %s464_s22 = sshll.u32 %s457_s14, 4  ;;  %s2872_s22 = int_to_ptr.vmem [resolvable:$true] %s464_s22 }
  0x5e   : > { %s2052_s3 = sshll.u32 %s2565_s21, 10  ;;  %s454_s1 = scalar_lea.sflag [#allocation4], %s453_s25 }
  0x5f   : > { %p2389_p3 = pneg %p2867_p1 }
  0x60   : > { %s2861_s4 = scalar_lea.hbm %s3356_s0, %s1994_s29  ;;  %s2392_s18 = scalar_lea.hbm %s3356_s0, 256 }
  0x61   : > { %s2387_s19 = scalar_lea.hbm %s2861_s4, 128  ;;  %p2393_p10 = scmp.lt.u32.totalorder %s2861_s4, %s3356_s0 }
  0x62   : > { %p2388_p7 = scmp.ne.s32.totalorder %s2861_s4, %s2387_s19  ;;  %p2394_p13 = scmp.lt.u32.totalorder %s2392_s18, %s2387_s19 }
  0x63   : > { %p2396_p8 = scmp.lt.u32.totalorder %s2387_s19, %s2861_s4 }
  0x64   : > { %p2390_p2 = pnand %p2389_p3, %p2388_p7  ;;  %p2395_p12 = por %p2394_p13, %p2393_p10 }
  0x66   : > { %p2391_p0 = pneg %p2390_p2  ;;  %p2397_p6 = por %p2396_p8, %p2395_p12 }
  0x68   : > { %p2398_p4 = pnand %p2397_p6, %p2391_p0 }
  0x6a   : > { %2401 = shalt.err (!%p2398_p4)
}
  0x6b   : > { %s2402_s25 = scalar_lea.vmem %s2872_s22, 128  ;;  %s2578_s13 = smov [#allocation3]  }
  0x6c   : > { %p2403_p7 = scmp.ne.s32.totalorder %s2872_s22, %s2402_s25  ;;  %s2407_s14 = sshll.u32 %s2578_s13, 4  ;;  %s2408_s14 = int_to_ptr.vmem [resolvable:$false] %s2407_s14 }
  0x6d   : > { %s2409_s5 = scalar_lea.vmem %s2408_s14, 256  ;;  %p2410_p9 = scmp.lt.s32.totalorder %s2872_s22, %s2408_s14 }
  0x6e   : > { %p2405_p2 = pnand %p2403_p7, %p2389_p3  ;;  %p2411_p10 = scmp.lt.s32.totalorder %s2409_s5, %s2402_s25 }
  0x70   : > { %p2406_p11 = pneg %p2405_p2  ;;  %p2412_p13 = por %p2411_p10, %p2410_p9 }
  0x72   : > { %p2413_p8 = pnand %p2412_p13, %p2406_p11 }
  0x74   : > { %2416 = shalt.err (!%p2413_p8)
}
  0x75   : > { %2213 = dma.hbm_to_vmem [thread:$0]  (!%p2867_p1), %s2861_s4, 128, %s2872_s22, %s454_s1  }
  0x76   : > { %s3359_s12 = sld [smem:[#allocation40_spill]]  ;;  %p3360_p11 = pneg %p2740_p5 }
  0x7c   : > { %s2904_s19 = scalar_lea.hbm %s3359_s12, %s2052_s3  ;;  %s2422_s4 = scalar_lea.hbm %s3359_s12, 2048 }
  0x7d   : > { %s2417_s24 = scalar_lea.hbm %s2904_s19, 1024  ;;  %p2423_p1 = scmp.lt.u32.totalorder %s2904_s19, %s3359_s12 }
  0x7e   : > { %p2418_p9 = scmp.ne.s32.totalorder %s2904_s19, %s2417_s24  ;;  %p2424_p3 = scmp.lt.u32.totalorder %s2422_s4, %s2417_s24 }
  0x7f   : > { %p2426_p12 = scmp.lt.u32.totalorder %s2417_s24, %s2904_s19 }
  0x80   : > { %p2420_p4 = pnand %p2418_p9, %p3360_p11  ;;  %p2425_p0 = por %p2424_p3, %p2423_p1 }
  0x82   : > { %p2421_p6 = pneg %p2420_p4  ;;  %p2427_p7 = por %p2426_p12, %p2425_p0 }
  0x84   : > { %p2428_p2 = pnand %p2427_p7, %p2421_p6 }
  0x86   : > { %2431 = shalt.err (!%p2428_p2)
}
  0x87   : > { %s2432_s3 = scalar_lea.vmem %s2907_s28, 1024  ;;  %p3361_p13 = pmov %p3360_p11 }
  0x88   : > { %p2433_p10 = scmp.ne.s32.totalorder %s2907_s28, %s2432_s3  ;;  %s2579_s25 = smov [#allocation8]  }
  0x89   : > { %s2437_s13 = sshll.u32 %s2579_s25, 4  ;;  %s2438_s13 = int_to_ptr.vmem [resolvable:$false] %s2437_s13 }
  0x8a   : > { %p2435_p8 = pnand %p2433_p10, %p3361_p13  ;;  %s2439_s14 = scalar_lea.vmem %s2438_s13, 2048 }
  0x8b   : > { %p2440_p11 = scmp.lt.s32.totalorder %s2907_s28, %s2438_s13  ;;  %p2441_p4 = scmp.lt.s32.totalorder %s2439_s14, %s2432_s3 }
  0x8c   : > { %p2436_p9 = pneg %p2435_p8 }
  0x8d   : > { %p2442_p1 = por %p2441_p4, %p2440_p11 }
  0x8f   : > { %p2443_p3 = pnand %p2442_p1, %p2436_p9 }
  0x91   : > { %2446 = shalt.err (!%p2443_p3)
}
  0x92   : > { %s3362_s5 = smov 4   ;;  %s3363_s15 = smov 64  }
  0x93   : > { %2219 = dma.hbm_to_vmem [thread:$0]  (!%p2740_p5), %s2904_s19, 1024, %s2907_s28, %s2746_s11, %s3363_s15, %s3363_s15, %s3362_s5  }
  0x94   : > { %p3364_p6 = scmp.ne.s32.totalorder %s3340_s26, 0 }
  0x95   : > { %s2939_s18 = sand.u32 (!%p3364_p6), 1, %s2549_s17   ;;  %p3365_p0 = scmp.ne.s32.totalorder (!%p3364_p6), %s3346_s7, 0 }
  0x96   : > { %585 = sbr.rel (%p3364_p6) target bundleno = 2435 (0x983), region = 76  ;;  %s3304_s24 = sshll.u32 (!%p3364_p6), %s2939_s18, 3 }
  0x97   : > { %s588_s10 = scalar_lea.sflag (!%p3364_p6), [#allocation4], %s2939_s18  ;;  %s2945_s9 = scalar_lea.vmem (!%p3364_p6), [#allocation3], %s3304_s24 }
  0x9d   : > { %2520 = dma.done.wait (%p3365_p0), %s588_s10, 128  }
  0x9e   : > { %2522 = vsyncadd (%p3365_p0), %s588_s10, 4294967168  ;;  %s596_s11 = sand.u32 1, %s2787_s27   ;;  %s598_s28 = sand.u32 1, %s2537_s30  }
  0x9f   : > { %s2003_s26 = sshll.u32 %s598_s28, 4  ;;  %s597_s19 = scalar_lea.sflag [#allocation7], %s596_s11 }
  0xa0   : > { %s2953_s22 = scalar_lea.vmem [#allocation6], %s2003_s26  ;;  %p3366_p5 = scmp.ne.s32.totalorder %s3348_s6, 0 }
  0xa2   : > { %2524 = dma.done.wait (%p3366_p5), %s597_s19, 1280  }
  0xa3   : > { %2526 = vsyncadd (%p3366_p5), %s597_s19, 4294966016  ;;  %s3367_s4 = sld [smem:[#allocation18_spill]]  ;;  %s2004_s7 = sshll.u32 %s598_s28, 6 }
  0xa4   : > { %p701_p12 = scmp.lt.s32.totalorder %s2561_s20, 1  ;;  %s3372_s17 = sld [smem:[#allocation32_spill]] }
  0xa5   : > { %s3374_s14 = sld [smem:[#allocation36_spill]]  ;;  %s3375_s11 = sld [smem:[#allocation37_spill]] }
  0xa6   : > { %s2962_s1 = scalar_select %p701_p12, %s2561_s20, 1 }
  0xa7   : > { %s3376_s29 = sld [smem:[#allocation38_spill]]  ;;  %s3378_s8 = sld [smem:[#allocation41_spill]] }
  0xa8   : > { %s3012_s6 = scalar_lea.vmem [#allocation8], %s2004_s7  ;;  %s3379_s23 = sshll.u32 %s2939_s18, 3 }
  0xa9   : > { %p704_p7 = scmp.lt.s32.totalorder %s3367_s4, 1  ;;  %s3016_s13 = scalar_lea.vmem [#allocation9], %s3379_s23 }
  0xaa   : > { %p2010_p2 = scmp.ne.s32.totalorder %s3367_s4, 0 }
  0xab   : > { %s2965_s27 = scalar_select %p704_p7, %s3367_s4, 1 }
  0xac   : > { %v743_v0 = vld [vmem:[%s2945_s9] sm:$0xff] (!%p2010_p2)  ;;  %vm744_vm0 = vcmask (!%p2010_p2), 261120  }
  0xad   : > { %s2053_s19 = sshll.u32 %s2965_s27, 4  ;;  %s723_s5 = scalar_lea.vmem %s3374_s14, %s2965_s27  ;;  %745 = vst.msk [vmem:[#allocation2] sm:$0xff] (!%p2010_p2), %vm744_vm0, %v743_v0 }
  0xae   : > { %s714_s30 = scalar_lea.vmem %s3372_s17, %s2053_s19  ;;  %s726_s28 = scalar_lea.vmem %s3375_s11, %s2965_s27 }
  0xaf   : > { %s3002_s24 = scalar_lea.vmem %s3376_s29, %s2053_s19  ;;  %s3377_s17 = sld [smem:[#allocation39_spill]] }
  0xb0   : > { %s737_s25 = scalar_lea.vmem %s3378_s8, %s2965_s27  ;;  %742 = sbr.rel (%p2010_p2) target bundleno = 183 (0xb7), region = 92 }
  0xb5   : > { %s734_s21 = scalar_lea.vmem %s3377_s17, %s2965_s27 }
  0xb7 PF: > { %v3020_v1 = vld [vmem:[#allocation2] sm:$0xff]  ;;  %vm750_vm1 = vcmask 261120   ;;  %v2580_v6 = vmov 0.0   ;;  %vm2581_vm2 = vmmov 0   ;;  %v2324_v7 = vld [vmem:[%s714_s30 + $0x8] sm:$0xff]   ;;  %s3382_s15 = sld [smem:[#allocation31_spill]] }
  0xb8   : > { %v751_v2 = vsel %vm750_vm1, %v3020_v1, 0.0  ;;  %v756_v3 = vmul.f32 %v3020_v1, %v3020_v1  ;;  %v2323_v5 = vld [vmem:[%s714_s30] sm:$0xff]   ;;  %2094 = vmatprep.subr.bf16.mxu1 %v2580_v6  ;;  %2098 = vmatprep.mubr.msk.bf16.mxu1 %vm2581_vm2, %v2580_v6  ;;  %s3380_s30 = sld [smem:[#allocation30_spill]]  ;;  %s3384_s10 = sld [smem:[#allocation33_spill]]  ;;  %vm880_vm3 = vcmask 64512   ;;  %vm1127_vm4 = vcmask 1043456  }
  0xb9   : > { %752 = vadd.xlane.f32.xlu0 %v751_v2  ;;  %2095 = vmatpush3.bf16.msra.mxu1 %v2323_v5  ;;  %s2582_s29 = smov 104   ;;  %s2583_s3 = smov 120  }
  0xba   : > { %v757_v4 = vsel %vm750_vm1, %v756_v3, 0.0  ;;  %2120 = vmatprep.subr.bf16.mxu0 %v2580_v6  ;;  %2096 = vmatprep.subr.bf16.mxu1 %v2580_v6  ;;  %s2584_s12 = smov 112   ;;  %s2585_s17 = smov 96  }
  0xbb   : > { %2122 = vmatprep.mubr.msk.bf16.mxu0 %vm2581_vm2, %v2580_v6  ;;  %s3386_s23 = sld [smem:[#allocation29_spill]] }
  0xbd   : > { %758 = vadd.xlane.f32.xlu0 %v757_v4  ;;  %2097 = vmatpush3.bf16.msra.mxu1 %v2324_v7  ;;  %s3383_s26 = scalar_lea.vmem %s3382_s15, %s2965_s27 }
  0xbe   : > { %2102 = vmatprep.subr.bf16.mxu1 %v2580_v6  ;;  %s3381_s9 = scalar_lea.vmem %s3380_s30, %s2965_s27  ;;  %v2012_v20 = vld [vmem:[%s3383_s26] ss:$0 sm:$0xff]  ;;  %s3385_s11 = scalar_lea.vmem %s3384_s10, %s2965_s27 }
  0xbf   : > { %v2011_v18 = vld [vmem:[%s3381_s9] ss:$0 sm:$0xff]  ;;  %s3388_s30 = sld [smem:[#allocation35_spill]] }
  0xc0   : > { %v2013_v24 = vld [vmem:[%s3385_s11] ss:$0 sm:$0xff] }
  0xc1   : > { %s3387_s0 = scalar_lea.vmem %s3386_s23, %s2962_s1  ;;  %s2586_s1 = smov 64  }
  0xc2   : > { %v2017_v53 = vld [vmem:[%s3387_s0] ss:$0 sm:$0xff] }
  0xc5   : > { %s3389_s9 = scalar_lea.vmem %s3388_s30, %s2965_s27 }
 0x146   : > { %v753_v8 = vpop.xlane.xlu0 %752 }
 0x147   : > { %v755_v9 = vmul.f32 0.03125, %v753_v8 }
 0x149   : > { %v761_v11 = vmul.f32 %v755_v9, %v755_v9  ;;  %v764_v16 = vsub.f32 %v3020_v1, %v755_v9 }
 0x14a   : > { %v759_v10 = vpop.xlane.xlu0 %758 }
 0x14b   : > { %v760_v12 = vmul.f32 0.03125, %v759_v10 }
 0x14d   : > { %v762_v13 = vsub.f32 %v760_v12, %v761_v11 }
 0x14f   : > { %v763_v14 = vmax.f32 %v762_v13, 0.0 }
 0x151   : > { %v765_v15 = vadd.f32 1e-05, %v763_v14 }
 0x153   : > { %2335 = vrsqrt.f32 %v765_v15 }
 0x15d   : > { %v2336_v17 = vpop.eup %2335 }
 0x15e   : > { %v767_v19 = vmul.f32 %v2336_v17, %v764_v16 }
 0x160   : > { %v774_v21 = vmul.f32 %v2011_v18, %v767_v19 }
 0x162   : > { %v781_v22 = vadd.f32 %v2012_v20, %v774_v21 }
 0x164   : > { %v782_v23 = vpack.c.bf16 %v781_v22, %v781_v22 }
 0x166   : > { %2099 = vmatmul.mubr.msk.bf16.vlgmr.msra.gmra.mrb[0].mxu1 %vm750_vm1, %v782_v23 }
 0x167   : > { %2104 = vmatprep.mubr.msk.bf16.mxu1 %vm2581_vm2, %v2580_v6 }
 0x239   : > { %v843_v25 = vpop.f32.mrb[0].mxu1 }
 0x23a   : > { %v844_v26 = vadd.f32 %v2013_v24, %v843_v25  ;;  %v2100_v27 = vpop.f32.mrb[1].mxu1 }
 0x23b   : > { %v846_v28 = vpop.f32.mrb[2].mxu1 }
 0x23c   : > { %856 = vrot.lane.b32.xlu0 %v844_v26, %s2582_s29  ;;  %850 = vrot.lane.b32.xlu1 %v844_v26, %s2583_s3  ;;  %v2101_v29 = vpop.f32.mrb[3].mxu1  ;;  %v3054_v30 = vpack.c.bf16 %v844_v26, %v844_v26  ;;  %v859_v39 = vmul.f32 0.35355338, %v844_v26 }
 0x23e   : > { %v863_v40 = vpack.c.bf16 %v859_v39, %v859_v39 }
 0x240   : > { %853 = vrot.lane.b32.xlu1 %v844_v26, %s2584_s12 }
 0x244   : > { %878 = vrot.lane.b32.xlu1 %v3054_v30, %s2585_s17 }
 0x2ae   : > { %v851_v31 = vpop.permute.xlu1 %850  ;;  %v857_v35 = vpop.permute.xlu0 %856 }
 0x2af   : > { %v3057_v32 = vpack.c.bf16 %v851_v31, %v851_v31  ;;  %v3063_v37 = vpack.c.bf16 %v857_v35, %v857_v35  ;;  %v860_v43 = vmul.f32 0.35355338, %v851_v31  ;;  %v862_v49 = vmul.f32 0.35355338, %v857_v35 }
 0x2b1   : > { %928 = vrot.lane.b32.xlu1 %v3057_v32, %s2585_s17  ;;  %v864_v45 = vpack.c.bf16 %v860_v43, %v860_v43  ;;  %v866_v51 = vpack.c.bf16 %v862_v49, %v862_v49 }
 0x2b2   : > { %v854_v33 = vpop.permute.xlu1 %853 }
 0x2b3   : > { %v3060_v34 = vpack.c.bf16 %v854_v33, %v854_v33  ;;  %v861_v50 = vmul.f32 0.35355338, %v854_v33 }
 0x2b5   : > { %977 = vrot.lane.b32.xlu1 %v3060_v34, %s2585_s17  ;;  %v865_v52 = vpack.c.bf16 %v861_v50, %v861_v50 }
 0x2b6   : > { %v879_v36 = vpop.permute.xlu1 %878 }
 0x2b7   : > { %v885_v38 = vsel %vm880_vm3, %v879_v36, 0 }
 0x2b8   : > { %2103 = vmatpush3.bf16.xpose.msra.mxu1 %v885_v38 }
 0x2b9   : > { %1026 = vrot.lane.b32.xlu1 %v3063_v37, %s2585_s17  ;;  %2108 = vmatprep.subr.bf16.mxu1 %v2580_v6 }
 0x2bf   : > { %2105 = vmatmul.mubr.msk.bf16.vlgmr.msra.gmra.mrb[4].mxu1 %vm880_vm3, %v863_v40 }
 0x2c0   : > { %2110 = vmatprep.mubr.msk.bf16.mxu1 %vm2581_vm2, %v2580_v6 }
 0x323   : > { %v929_v41 = vpop.permute.xlu1 %928 }
 0x324   : > { %v934_v42 = vsel %vm880_vm3, %v929_v41, 0 }
 0x325   : > { %2109 = vmatpush3.bf16.xpose.msra.mxu1 %v934_v42 }
 0x326   : > { %2114 = vmatprep.subr.bf16.mxu1 %v2580_v6 }
 0x327   : > { %v978_v44 = vpop.permute.xlu1 %977 }
 0x328   : > { %v983_v47 = vsel %vm880_vm3, %v978_v44, 0 }
 0x32b   : > { %v1027_v46 = vpop.permute.xlu1 %1026 }
 0x32c   : > { %2111 = vmatmul.mubr.msk.bf16.vlgmr.msra.gmra.mrb[8].mxu1 %vm880_vm3, %v864_v45  ;;  %v1032_v48 = vsel %vm880_vm3, %v1027_v46, 0 }
 0x32d   : > { %2115 = vmatpush3.bf16.xpose.msra.mxu1 %v983_v47  ;;  %2121 = vmatpush3.bf16.xpose.msra.mxu0 %v1032_v48 }
 0x32e   : > { %2116 = vmatprep.mubr.msk.bf16.mxu1 %vm2581_vm2, %v2580_v6  ;;  %2126 = vmatprep.subr.bf16.mxu1 %v2580_v6 }
 0x32f   : > { %2132 = vmatprep.subr.bf16.mxu0 %v2580_v6 }
 0x334   : > { %2117 = vmatmul.mubr.msk.bf16.vlgmr.msra.gmra.mrb[12].mxu1 %vm880_vm3, %v865_v52  ;;  %2123 = vmatmul.mubr.msk.bf16.vlgmr.msra.gmra.mrb[0].mxu0 %vm880_vm3, %v866_v51 }
 0x335   : > { %2128 = vmatprep.mubr.msk.bf16.mxu1 %vm2581_vm2, %v2580_v6  ;;  %2134 = vmatprep.mubr.msk.bf16.mxu0 %vm2581_vm2, %v2580_v6 }
 0x392   : > { %v921_v54 = vpop.f32.mrb[4].mxu1 }
 0x393   : > { %v922_v55 = vadd.f32 %v2017_v53, %v921_v54  ;;  %v2106_v56 = vpop.f32.mrb[5].mxu1 }
 0x394   : > { %v924_v57 = vpop.f32.mrb[6].mxu1 }
 0x395   : > { %v2107_v58 = vpop.f32.mrb[7].mxu1  ;;  %v1074_v59 = vsel %vm880_vm3, %v922_v55, -inf  ;;  %v1319_v57 = vld [vmem:[%s2953_s22] sm:$0xf] }
 0x396   : > { %1075 = vmax.xlane.f32.xlu1 %v1074_v59 }
 0x3ff   : > { %v970_v60 = vpop.f32.mrb[8].mxu1 }
 0x400   : > { %v971_v61 = vadd.f32 %v2017_v53, %v970_v60  ;;  %v2112_v62 = vpop.f32.mrb[9].mxu1 }
 0x401   : > { %v973_v63 = vpop.f32.mrb[10].mxu1  ;;  %v1320_v62 = vld [vmem:[%s2953_s22 + $0x4] sm:$0xf] }
 0x402   : > { %v2113_v0 = vpop.f32.mrb[11].mxu1  ;;  %v1077_v2 = vsel %vm880_vm3, %v971_v61, -inf  ;;  %v1373_v63 = vsel %vm1127_vm4, %v1320_v62, 0 }
 0x403   : > { %1078 = vmax.xlane.f32.xlu0 %v1077_v2  ;;  %v1321_v0 = vld [vmem:[%s2953_s22 + $0x8] sm:$0xf] }
 0x407   : > { %v1019_v3 = vpop.f32.mrb[12].mxu1  ;;  %v1068_v4 = vpop.f32.mrb[0].mxu0 }
 0x408   : > { %v1020_v5 = vadd.f32 %v2017_v53, %v1019_v3  ;;  %v1069_v7 = vadd.f32 %v2017_v53, %v1068_v4  ;;  %v2118_v8 = vpop.f32.mrb[13].mxu1  ;;  %v2124_v9 = vpop.f32.mrb[1].mxu0 }
 0x409   : > { %v1022_v10 = vpop.f32.mrb[14].mxu1  ;;  %v1071_v11 = vpop.f32.mrb[2].mxu0  ;;  %v1322_v9 = vld [vmem:[%s2953_s22 + $0xc] sm:$0xf] }
 0x40a   : > { %v2119_v12 = vpop.f32.mrb[15].mxu1  ;;  %v2125_v13 = vpop.f32.mrb[3].mxu0  ;;  %v1083_v14 = vsel %vm880_vm3, %v1069_v7, -inf  ;;  %v1080_v15 = vsel %vm880_vm3, %v1020_v5, -inf }
 0x40b   : > { %1084 = vmax.xlane.f32.xlu0 %v1083_v14  ;;  %1081 = vmax.xlane.f32.xlu1 %v1080_v15  ;;  %v1465_v13 = vsel %vm1127_vm4, %v1322_v9, 0  ;;  %v2032_v9 = vld [vmem:[%s726_s28] ss:$0 sm:$0xff] }
 0x41c   : > { %1122 = vrot.lane.b32.xlu1 %v3054_v30, %s2586_s1 }
 0x423   : > { %v1076_v16 = vpop.xlane.xlu1 %1075 }
 0x424   : > { %v1086_v17 = vsub.f32 %v922_v55, %v1076_v16 }
 0x426   : > { %v1090_v18 = vmul.f32 1.442695, %v1086_v17 }
 0x428   : > { %2337 = vpow2.f32 %v1090_v18 }
 0x432   : > { %v2338_v19 = vpop.eup %2337 }
 0x433   : > { %v1098_v20 = vsel %vm880_vm3, %v2338_v19, 0.0 }
 0x440   : > { %1099 = vadd.xlane.f32.xlu1 %v1098_v20 }
 0x451   : > { %1219 = vrot.lane.b32.xlu1 %v3060_v34, %s2586_s1 }
 0x490   : > { %v1079_v21 = vpop.xlane.xlu0 %1078 }
 0x491   : > { %v1087_v22 = vsub.f32 %v971_v61, %v1079_v21  ;;  %v1327_v61 = vsel %vm1127_vm4, %v1319_v57, 0  ;;  %v2327_v57 = vld [vmem:[%s3012_s6] sm:$0xff]  }
 0x493   : > { %v1092_v23 = vmul.f32 1.442695, %v1087_v22 }
 0x495   : > { %2339 = vpow2.f32 %v1092_v23 }
 0x498   : > { %v1085_v24 = vpop.xlane.xlu0 %1084  ;;  %v1082_v25 = vpop.xlane.xlu1 %1081 }
 0x499   : > { %v1089_v26 = vsub.f32 %v1069_v7, %v1085_v24  ;;  %v1088_v27 = vsub.f32 %v1020_v5, %v1082_v25  ;;  %v1419_v5 = vsel %vm1127_vm4, %v1321_v0, 0 }
 0x49b   : > { %v1096_v28 = vmul.f32 1.442695, %v1089_v26  ;;  %v1094_v29 = vmul.f32 1.442695, %v1088_v27 }
 0x49c   : > { %v1123_v30 = vpop.permute.xlu1 %1122 }
 0x49d   : > { %2341 = vpow2.f32 %v1096_v28  ;;  %v1129_v31 = vsel %vm1127_vm4, %v1123_v30, 0 }
 0x49e   : > { %2343 = vpow2.f32 %v1094_v29  ;;  %2127 = vmatpush3.bf16.msra.mxu1 %v1129_v31 }
 0x49f   : > { %v2340_v33 = vpop.eup %2339  ;;  %2138 = vmatprep.subr.bf16.mxu1 %v2580_v6 }
 0x4a0   : > { %v1101_v34 = vsel %vm880_vm3, %v2340_v33, 0.0 }
 0x4a1   : > { %1102 = vadd.xlane.f32.xlu0 %v1101_v34 }
 0x4a7   : > { %v2342_v35 = vpop.eup %2341 }
 0x4a8   : > { %v2344_v36 = vpop.eup %2343  ;;  %v1107_v38 = vsel %vm880_vm3, %v2342_v35, 0.0 }
 0x4a9   : > { %1108 = vadd.xlane.f32.xlu0 %v1107_v38  ;;  %v1104_v39 = vsel %vm880_vm3, %v2344_v36, 0.0 }
 0x4aa   : > { %1105 = vadd.xlane.f32.xlu1 %v1104_v39 }
 0x4bb   : > { %1267 = vrot.lane.b32.xlu1 %v3063_v37, %s2586_s1 }
 0x4bf   : > { %1171 = vrot.lane.b32.xlu0 %v3057_v32, %s2586_s1 }
 0x4cd   : > { %v1100_v40 = vpop.xlane.xlu1 %1099 }
 0x4ce   : > { %2345 = vrcp.f32 %v1100_v40 }
 0x4d1   : > { %v1220_v43 = vpop.permute.xlu1 %1219 }
 0x4d2   : > { %v1225_v45 = vsel %vm1127_vm4, %v1220_v43, 0 }
 0x4d8   : > { %v2346_v41 = vpop.eup %2345 }
 0x4d9   : > { %v1114_v42 = vmul.f32 %v2346_v41, %v2338_v19 }
 0x4db   : > { %v1118_v44 = vpack.c.bf16 %v1114_v42, %v1114_v42 }
 0x4dd   : > { %2129 = vmatmul.mubr.msk.bf16.vlgmr.msra.gmra.mrb[16].mxu1 %vm880_vm3, %v1118_v44 }
 0x4de   : > { %2139 = vmatpush3.bf16.msra.mxu1 %v1225_v45  ;;  %2140 = vmatprep.mubr.msk.bf16.mxu1 %vm2581_vm2, %v2580_v6 }
 0x4df   : > { %2150 = vmatprep.subr.bf16.mxu1 %v2580_v6 }
 0x52e   : > { %v1103_v37 = vpop.xlane.xlu0 %1102 }
 0x52f   : > { %2347 = vrcp.f32 %v1103_v37 }
 0x536   : > { %v1109_v46 = vpop.xlane.xlu0 %1108 }
 0x537   : > { %2349 = vrcp.f32 %v1109_v46  ;;  %v1106_v32 = vpop.xlane.xlu1 %1105 }
 0x538   : > { %2351 = vrcp.f32 %v1106_v32  ;;  %v2030_v32 = vld [vmem:[%s3389_s9] ss:$0 sm:$0xff] }
 0x539   : > { %v2348_v47 = vpop.eup %2347 }
 0x53a   : > { %v1115_v48 = vmul.f32 %v2348_v47, %v2340_v33  ;;  %v1172_v49 = vpop.permute.xlu0 %1171 }
 0x53b   : > { %v1177_v50 = vsel %vm1127_vm4, %v1172_v49, 0  ;;  %v1268_v51 = vpop.permute.xlu1 %1267 }
 0x53c   : > { %2133 = vmatpush3.bf16.msra.mxu0 %v1177_v50  ;;  %v1119_v52 = vpack.c.bf16 %v1115_v48, %v1115_v48  ;;  %v1273_v53 = vsel %vm1127_vm4, %v1268_v51, 0 }
 0x53d   : > { %2144 = vmatprep.subr.bf16.mxu0 %v2580_v6 }
 0x53f   : > { %2135 = vmatmul.mubr.msk.bf16.vlgmr.msra.gmra.mrb[4].mxu0 %vm880_vm3, %v1119_v52 }
 0x540   : > { %2145 = vmatpush3.bf16.msra.mxu0 %v1273_v53  ;;  %2146 = vmatprep.mubr.msk.bf16.mxu0 %vm2581_vm2, %v2580_v6 }
 0x541   : > { %v2350_v54 = vpop.eup %2349  ;;  %2156 = vmatprep.subr.bf16.mxu0 %v2580_v6 }
 0x542   : > { %v2352_v55 = vpop.eup %2351  ;;  %v1117_v56 = vmul.f32 %v2350_v54, %v2342_v35 }
 0x543   : > { %v1116_v58 = vmul.f32 %v2352_v55, %v2344_v36  ;;  %v2325_v55 = vld [vmem:[%s3002_s24] sm:$0xff]  }
 0x544   : > { %v1121_v59 = vpack.c.bf16 %v1117_v56, %v1117_v56  ;;  %v2326_v56 = vld [vmem:[%s3002_s24 + $0x8] sm:$0xff]  }
 0x545   : > { %v1120_v60 = vpack.c.bf16 %v1116_v58, %v1116_v58  ;;  %v2329_v58 = vld [vmem:[%s3012_s6 + $0x10] sm:$0xff]  }
 0x547   : > { %2141 = vmatmul.mubr.msk.bf16.vlgmr.msra.gmra.mrb[20].mxu1 %vm880_vm3, %v1120_v60  ;;  %2147 = vmatmul.mubr.msk.bf16.vlgmr.msra.gmra.mrb[8].mxu0 %vm880_vm3, %v1121_v59 }
 0x548   : > { %2151 = vmatpush3.bf16.msra.mxu1 %v1327_v61  ;;  %2152 = vmatprep.mubr.msk.bf16.mxu1 %vm2581_vm2, %v2580_v6 }
 0x549   : > { %2158 = vmatprep.mubr.msk.bf16.mxu0 %vm2581_vm2, %v2580_v6  ;;  %2162 = vmatprep.subr.bf16.mxu1 %v2580_v6 }
 0x54a   : > { %2157 = vmatpush3.bf16.msra.mxu0 %v1373_v63 }
 0x54b   : > { %2168 = vmatprep.subr.bf16.mxu0 %v2580_v6 }
 0x5b0   : > { %v1165_v2 = vpop.f32.mrb[16].mxu1 }
 0x5b1   : > { %v1315_v3 = vpack.c.bf16 %v1165_v2, %v1165_v2  ;;  %v2130_v4 = vpop.f32.mrb[17].mxu1 }
 0x5b2   : > { %v1168_v7 = vpop.f32.mrb[18].mxu1 }
 0x5b3   : > { %v2131_v8 = vpop.f32.mrb[19].mxu1  ;;  %2153 = vmatmul.mubr.msk.bf16.vlgmr.msra.gmra.mrb[24].mxu1 %vm880_vm3, %v1315_v3  ;;  %v2031_v7 = vld [vmem:[%s723_s5] ss:$0 sm:$0xff] }
 0x5b4   : > { %2163 = vmatpush3.bf16.msra.mxu1 %v1419_v5  ;;  %2164 = vmatprep.mubr.msk.bf16.mxu1 %vm2581_vm2, %v2580_v6 }
 0x5b5   : > { %2174 = vmatprep.subr.bf16.mxu1 %v2580_v6 }
 0x612   : > { %v1213_v10 = vpop.f32.mrb[4].mxu0 }
 0x613   : > { %v1316_v11 = vpack.c.bf16 %v1213_v10, %v1213_v10  ;;  %v2136_v12 = vpop.f32.mrb[5].mxu0 }
 0x614   : > { %v1216_v14 = vpop.f32.mrb[6].mxu0 }
 0x615   : > { %v2137_v15 = vpop.f32.mrb[7].mxu0  ;;  %2159 = vmatmul.mubr.msk.bf16.vlgmr.msra.gmra.mrb[12].mxu0 %vm880_vm3, %v1316_v11  ;;  %v2331_v14 = vld [vmem:[%s3012_s6 + $0x20] sm:$0xff]  }
 0x616   : > { %2169 = vmatpush3.bf16.msra.mxu0 %v1465_v13  ;;  %2170 = vmatprep.mubr.msk.bf16.mxu0 %vm2581_vm2, %v2580_v6  ;;  %v2330_v13 = vld [vmem:[%s3012_s6 + $0x18] sm:$0xff]   ;;  %v2332_v15 = vld [vmem:[%s3012_s6 + $0x28] sm:$0xff]  }
 0x617   : > { %2182 = vmatprep.subr.bf16.mxu0 %v2580_v6 }
 0x61a   : > { %v1261_v16 = vpop.f32.mrb[20].mxu1  ;;  %v1309_v17 = vpop.f32.mrb[8].mxu0 }
 0x61b   : > { %v1317_v18 = vpack.c.bf16 %v1261_v16, %v1261_v16  ;;  %v2142_v19 = vpop.f32.mrb[21].mxu1  ;;  %v1318_v20 = vpack.c.bf16 %v1309_v17, %v1309_v17  ;;  %v2148_v21 = vpop.f32.mrb[9].mxu0  ;;  %v2333_v16 = vld [vmem:[%s3012_s6 + $0x30] sm:$0xff]   ;;  %v2334_v17 = vld [vmem:[%s3012_s6 + $0x38] sm:$0xff]  }
 0x61c   : > { %v1264_v22 = vpop.f32.mrb[22].mxu1  ;;  %v1312_v23 = vpop.f32.mrb[10].mxu0 }
 0x61d   : > { %v2143_v24 = vpop.f32.mrb[23].mxu1  ;;  %2165 = vmatmul.mubr.msk.bf16.vlgmr.msra.gmra.mrb[28].mxu1 %vm880_vm3, %v1317_v18  ;;  %v2149_v25 = vpop.f32.mrb[11].mxu0  ;;  %2171 = vmatmul.mubr.msk.bf16.vlgmr.msra.gmra.mrb[16].mxu0 %vm880_vm3, %v1318_v20  ;;  %v2033_v18 = vld [vmem:[%s734_s21] ss:$0 sm:$0xff]  ;;  %s3394_s21 = sld [smem:[#allocation18_spill]] }
 0x61e   : > { %2178 = vmatprep.mubr.msk.bf16.mxu1 %vm2581_vm2, %v2580_v6  ;;  %2198 = vmatprep.mubr.msk.bf16.mxu0 %vm2581_vm2, %v2580_v6 }
 0x61f   : > { %2175 = vmatpush3.bf16.msra.mxu1 %v2325_v55  ;;  %2183 = vmatpush3.bf16.msra.mxu0 %v2327_v57 }
 0x620   : > { %2176 = vmatprep.subr.bf16.mxu1 %v2580_v6  ;;  %2184 = vmatprep.subr.bf16.mxu0 %v2580_v6 }
 0x623   : > { %2177 = vmatpush3.bf16.msra.mxu1 %v2326_v56  ;;  %p2046_p10 = scmp.ne.s32.totalorder %s3394_s21, 1 }
 0x686   : > { %v1363_v26 = vpop.f32.mrb[24].mxu1 }
 0x687   : > { %v2154_v27 = vpop.f32.mrb[25].mxu1  ;;  %v1507_v31 = vsel %vm750_vm1, %v1363_v26, 0.0 }
 0x688   : > { %v1366_v28 = vpop.f32.mrb[26].mxu1 }
 0x689   : > { %v2155_v29 = vpop.f32.mrb[27].mxu1 }
 0x68a   : > { %v2037_v29 = vld [vmem:[%s737_s25] ss:$0 sm:$0xff] }
 0x6e8   : > { %v1409_v30 = vpop.f32.mrb[12].mxu0 }
 0x6e9   : > { %v1508_v33 = vsel %vm750_vm1, %v1409_v30, 0.0  ;;  %v2160_v34 = vpop.f32.mrb[13].mxu0 }
 0x6ea   : > { %v1509_v35 = vadd.f32 %v1508_v33, %v1507_v31  ;;  %v1412_v36 = vpop.f32.mrb[14].mxu0 }
 0x6eb   : > { %v2161_v38 = vpop.f32.mrb[15].mxu0 }
 0x6f0   : > { %v1455_v39 = vpop.f32.mrb[28].mxu1  ;;  %v1501_v40 = vpop.f32.mrb[16].mxu0 }
 0x6f1   : > { %v1510_v41 = vsel %vm750_vm1, %v1455_v39, 0.0  ;;  %v2166_v42 = vpop.f32.mrb[29].mxu1  ;;  %v1512_v43 = vsel %vm750_vm1, %v1501_v40, 0.0  ;;  %v2172_v44 = vpop.f32.mrb[17].mxu0 }
 0x6f2   : > { %v1511_v45 = vadd.f32 %v1510_v41, %v1509_v35  ;;  %v1458_v37 = vpop.f32.mrb[30].mxu1  ;;  %v1504_v46 = vpop.f32.mrb[18].mxu0 }
 0x6f3   : > { %v2167_v47 = vpop.f32.mrb[31].mxu1  ;;  %v2173_v48 = vpop.f32.mrb[19].mxu0 }
 0x6f4   : > { %v1513_v49 = vadd.f32 %v1512_v43, %v1511_v45 }
 0x6f6   : > { %v1521_v50 = vadd.f32 %v2030_v32, %v1513_v49 }
 0x6f8   : > { %v3161_v51 = vadd.f32 %v1521_v50, %v3020_v1  ;;  %v2328_v1 = vld [vmem:[%s3012_s6 + $0x8] sm:$0xff]  }
 0x6f9   : > { %2185 = vmatpush3.bf16.msra.mxu0 %v2328_v1 }
 0x6fa   : > { %v1525_v52 = vsel %vm750_vm1, %v3161_v51, 0.0  ;;  %v1529_v53 = vmul.f32 %v3161_v51, %v3161_v51  ;;  %2186 = vmatprep.subr.bf16.mxu0 %v2580_v6 }
 0x6fb   : > { %1526 = vadd.xlane.f32.xlu0 %v1525_v52 }
 0x6fc   : > { %v1530_v54 = vsel %vm750_vm1, %v1529_v53, 0.0 }
 0x6fd   : > { %1531 = vadd.xlane.f32.xlu1 %v1530_v54  ;;  %2187 = vmatpush3.bf16.msra.mxu0 %v2329_v58 }
 0x6fe   : > { %2188 = vmatprep.subr.bf16.mxu0 %v2580_v6 }
 0x701   : > { %2189 = vmatpush3.bf16.msra.mxu0 %v2330_v13 }
 0x702   : > { %2190 = vmatprep.subr.bf16.mxu0 %v2580_v6 }
 0x705   : > { %2191 = vmatpush3.bf16.msra.mxu0 %v2331_v14 }
 0x706   : > { %2192 = vmatprep.subr.bf16.mxu0 %v2580_v6 }
 0x709   : > { %2193 = vmatpush3.bf16.msra.mxu0 %v2332_v15 }
 0x70a   : > { %2194 = vmatprep.subr.bf16.mxu0 %v2580_v6 }
 0x70d   : > { %2195 = vmatpush3.bf16.msra.mxu0 %v2333_v16 }
 0x70e   : > { %2196 = vmatprep.subr.bf16.mxu0 %v2580_v6 }
 0x711   : > { %2197 = vmatpush3.bf16.msra.mxu0 %v2334_v17 }
 0x788   : > { %v1527_v59 = vpop.xlane.xlu0 %1526 }
 0x789   : > { %v1528_v60 = vmul.f32 0.03125, %v1527_v59 }
 0x78a   : > { %v1532_v61 = vpop.xlane.xlu1 %1531 }
 0x78b   : > { %v1534_v62 = vmul.f32 %v1528_v60, %v1528_v60  ;;  %v1533_v63 = vmul.f32 0.03125, %v1532_v61  ;;  %v1537_v4 = vsub.f32 %v3161_v51, %v1528_v60 }
 0x78d   : > { %v1535_v0 = vsub.f32 %v1533_v63, %v1534_v62 }
 0x78f   : > { %v1536_v2 = vmax.f32 %v1535_v0, 0.0 }
 0x791   : > { %v1538_v3 = vadd.f32 1e-05, %v1536_v2 }
 0x793   : > { %2353 = vrsqrt.f32 %v1538_v3 }
 0x79d   : > { %v2354_v5 = vpop.eup %2353 }
 0x79e   : > { %v1540_v8 = vmul.f32 %v2354_v5, %v1537_v4 }
 0x7a0   : > { %v1547_v10 = vmul.f32 %v2031_v7, %v1540_v8 }
 0x7a2   : > { %v1554_v11 = vadd.f32 %v2032_v9, %v1547_v10 }
 0x7a4   : > { %v1555_v12 = vpack.c.bf16 %v1554_v11, %v1554_v11 }
 0x7a6   : > { %2179 = vmatmul.mubr.msk.bf16.vlgmr.msra.gmra.mrb[32].mxu1 %vm750_vm1, %v1555_v12 }
 0x879   : > { %v1616_v19 = vpop.f32.mrb[32].mxu1 }
 0x87a   : > { %v1617_v20 = vadd.f32 %v2033_v18, %v1616_v19  ;;  %v2180_v21 = vpop.f32.mrb[33].mxu1 }
 0x87b   : > { %v1619_v22 = vpop.f32.mrb[34].mxu1 }
 0x87c   : > { %v1623_v23 = vmul.f32 0.70710677, %v1617_v20  ;;  %v2181_v24 = vpop.f32.mrb[35].mxu1  ;;  %v1622_v26 = vmul.f32 0.5, %v1617_v20 }
 0x87e   : > { %2355 = verf.f32 %v1623_v23 }
 0x888   : > { %v2356_v25 = vpop.eup %2355 }
 0x889   : > { %v1625_v27 = vadd.f32 1.0, %v2356_v25 }
 0x88b   : > { %v1626_v28 = vmul.f32 %v1625_v27, %v1622_v26 }
 0x88d   : > { %v1627_v6 = vpack.c.bf16 %v1626_v28, %v1626_v28 }
 0x88f   : > { %2199 = vmatmul.mubr.bf16.vlgmr.msra.gmra.mrb[20].mxu0 %v1627_v6 }
 0x961   : > { %1744 = sbr.rel (%p2046_p10) target bundleno = 2408 (0x968), region = 96 }
 0x962   : > { %v1733_v30 = vpop.f32.mrb[20].mxu0 }
 0x963   : > { %v1734_v31 = vadd.f32 %v2037_v29, %v1733_v30  ;;  %v2200_v33 = vpop.f32.mrb[21].mxu0 }
 0x964   : > { %v1736_v34 = vpop.f32.mrb[22].mxu0 }
 0x965   : > { %v1739_v35 = vadd.f32 %v1734_v31, %v3161_v51  ;;  %v2201_v36 = vpop.f32.mrb[23].mxu0 }
 0x967   : > { %1740 = vst.msk [vmem:[#allocation2] sm:$0xff] %vm750_vm1, %v1739_v35  ;;  %1745 = vst.msk [vmem:[%s3016_s13] sm:$0xff] (!%p2046_p10), %vm750_vm1, %v1739_v35 }
 0x968 PF: > { %s3395_s27 = sld [smem:[#allocation26_spill]]  ;;  %s2048_s25 = sshll.u32 %s2561_s20, 7 }
 0x969   : > { %s3396_s12 = sld [smem:[#allocation42_spill]]  ;;  %s1760_s16 = sshll.u32 %s3016_s13, 4  ;;  %s1761_s16 = int_to_ptr.vmem [resolvable:$true] %s1760_s16 }
 0x96a   : > { %s1747_s8 = scalar_lea.sflag [#allocation5], %s2939_s18  ;;  %s2447_s23 = scalar_lea.vmem %s1761_s16, 128 }
 0x96b   : > { %p2448_p13 = scmp.ne.s32.totalorder %s1761_s16, %s2447_s23  ;;  %s2587_s0 = smov [#allocation9]  }
 0x96c   : > { %s2451_s1 = sshll.u32 %s2587_s0, 4  ;;  %s2452_s1 = int_to_ptr.vmem [resolvable:$false] %s2451_s1 }
 0x96d   : > { %s2453_s22 = scalar_lea.vmem %s2452_s1, 256  ;;  %p2454_p4 = scmp.lt.s32.totalorder %s1761_s16, %s2452_s1 }
 0x96e   : > { %p3397_p8 = scmp.ne.s32.totalorder %s3395_s27, 0  ;;  %p2455_p1 = scmp.lt.s32.totalorder %s2453_s22, %s2447_s23 }
 0x96f   : > { %s3217_s17 = scalar_lea.hbm %s3396_s12, %s2048_s25 }
 0x970   : > { %p2449_p9 = pnand %p2448_p13, %p3397_p8  ;;  %p2456_p3 = por %p2455_p1, %p2454_p4 }
 0x972   : > { %p2450_p11 = pneg %p2449_p9 }
 0x974   : > { %p2457_p6 = pnand %p2456_p3, %p2450_p11 }
 0x976   : > { %2460 = shalt.err (!%p2457_p6)
}
 0x977   : > { %s2461_s20 = scalar_lea.hbm %s3217_s17, 128  ;;  %s2465_s2 = scalar_lea.hbm %s3396_s12, 256 }
 0x978   : > { %p2462_p0 = scmp.ne.s32.totalorder %s3217_s17, %s2461_s20  ;;  %p2466_p7 = scmp.lt.u32.totalorder %s3217_s17, %s3396_s12 }
 0x979   : > { %p2467_p2 = scmp.lt.u32.totalorder %s2465_s2, %s2461_s20  ;;  %p2469_p13 = scmp.lt.u32.totalorder %s2461_s20, %s3217_s17 }
 0x97a   : > { %p2463_p5 = pnand %p2462_p0, %p3397_p8 }
 0x97b   : > { %p2468_p10 = por %p2467_p2, %p2466_p7 }
 0x97c   : > { %p2464_p12 = pneg %p2463_p5 }
 0x97d   : > { %p2470_p9 = por %p2469_p13, %p2468_p10 }
 0x97f   : > { %p2471_p11 = pnand %p2470_p9, %p2464_p12 }
 0x981   : > { %2474 = shalt.err (!%p2471_p11)
}
 0x982   : > { %2208 = dma.vmem_to_hbm [thread:$0]  (%p3397_p8), %s1761_s16, 128, %s3217_s17, %s1747_s8  }
 0x983 PF: > { %s3398_s24 = sld [smem:[#allocation21_spill]]  ;;  %s3399_s4 = sld [smem:[#allocation15_spill]] }
 0x984   : > { %s3400_s7 = sld [smem:[#allocation27_spill]] }
 0x989   : > { %p2225_p4 = scmp.ge.s32.totalorder %s3398_s24, 2  ;;  %s1772_s15 = sand.u32 1, %s3399_s4  }
 0x98a   : > { %p3401_p1 = scmp.ne.s32.totalorder %s3400_s7, 0  ;;  %s1773_s26 = scalar_lea.sflag [#allocation5], %s1772_s15 }
 0x98c   : > { %p2221_p3 = pnand %p2225_p4, %p3401_p1 }
 0x98e   : > { %2528 = dma.done.wait (!%p2221_p3), %s1773_s26, 128  }
 0x98f   : > { %2530 = vsyncadd (!%p2221_p3), %s1773_s26, 4294967168  ;;  %s33_s23 = sadd.s32 1, %s3398_s24   ;;  %s3402_s29 = sld [smem:[#allocation13_spill]] }
 0x990   : > { %p30_p6 = scmp.ge.s32.totalorder %s33_s23, 6   ;;  %s3403_s30 = sld [smem:[#allocation14_spill]] }
 0x991   : > { %s3404_s15 = sld [smem:[#allocation24_spill]]  ;;  %s3405_s16 = sld [smem:[#allocation16_spill]] }
 0x992   : > { %s3406_s17 = sld [smem:[#allocation17_spill]]  ;;  %s3407_s18 = sld [smem:[#allocation25_spill]] }
 0x993   : > { %s3408_s19 = sld [smem:[#allocation19_spill]]  ;;  %s3409_s20 = sld [smem:[#allocation20_spill]] }
 0x994   : > { %s3410_s21 = sld [smem:[#allocation22_spill]]  ;;  %s3411_s22 = sld [smem:[#allocation23_spill]] }
 0x995   :  { %32 = sbr.rel (!%p30_p6) target bundleno = 27 (0x1b), region = 186 }
 0x99c   :  { %1778 = vsyncpa [#allocation4], 1 }
 0x99d   :  { %1780 = vsyncpa [#allocation4 + $0x1], 1 }
 0x99e   :  { %1781 = vsyncpa [#allocation7], 1 }
 0x99f   :  { %1783 = vsyncpa [#allocation7 + $0x1], 1 }
 0x9a0   :  { %1784 = vsyncpa [#allocation5], 1 }
 0x9a1   :  { %1786 = vsyncpa [#allocation5 + $0x1], 1 }

</bundles_post_ra>
